<compile_context>
chip_gen: v7x
topology: tpu7x:2x2x1
jax: 0.10.0
libtpu: 0.0.40
codegen_flags: <defaults>
</compile_context>

<pallas_src>
from functools import partial

import jax
import jax.numpy as jnp
import numpy as np
from jax import lax
from jax.experimental import pallas as pl
from jax.experimental.pallas import tpu as pltpu


# ----------------------------------------------------------------------------
# Kernels
# ----------------------------------------------------------------------------
def _ln_channels_last_kernel(x_ref, w_ref, b_ref, o_ref, *, eps):
    """x_ref: (TM, C) rows; normalize each row over C, then affine."""
    x = x_ref[...].astype(jnp.float32)                      # (TM, C)
    mean = jnp.mean(x, axis=-1, keepdims=True)              # (TM, 1)
    xc = x - mean
    var = jnp.mean(xc * xc, axis=-1, keepdims=True)         # biased variance
    inv = lax.rsqrt(var + eps)                              # EUP
    w = w_ref[...].astype(jnp.float32)                      # (1, C)
    b = b_ref[...].astype(jnp.float32)                      # (1, C)
    o_ref[...] = (xc * inv * w + b).astype(o_ref.dtype)


def _ln_channels_first_kernel(x_ref, w_ref, b_ref, o_ref, *, eps):
    """x_ref: (1, C, TS); normalize over the channel axis for each spatial pos."""
    x = x_ref[0].astype(jnp.float32)                        # (C, TS)
    mean = jnp.mean(x, axis=0, keepdims=True)               # (1, TS)
    xc = x - mean
    var = jnp.mean(xc * xc, axis=0, keepdims=True)          # biased variance
    inv = lax.rsqrt(var + eps)                              # EUP
    w = w_ref[...].astype(jnp.float32)                      # (C, 1)
    b = b_ref[...].astype(jnp.float32)                      # (C, 1)
    o_ref[0] = (xc * inv * w + b).astype(o_ref.dtype)


# ----------------------------------------------------------------------------
# Wrappers
# ----------------------------------------------------------------------------
def layer_norm(x, weight, bias, *, eps=1e-6, data_format="channels_last"):
    """Pallas LayerNorm. weight/bias have shape (C,)."""
    if data_format == "channels_last":
        orig_shape = x.shape
        C = orig_shape[-1]
        M = 1
        for d in orig_shape[:-1]:
            M *= int(d)
        x2 = x.reshape(M, C)

        # Big row tile (mem-bound roofline needs ~512 rows/step); 512 is a
        # multiple of 8 so partial-array edges are still legal block shapes.
        TM = 512 if M >= 512 else M
        grid = (pl.cdiv(M, TM),)

        out = pl.pallas_call(
            partial(_ln_channels_last_kernel, eps=eps),
            out_shape=jax.ShapeDtypeStruct((M, C), x.dtype),
            grid=grid,
            in_specs=[
                pl.BlockSpec((TM, C), lambda i: (i, 0)),
                pl.BlockSpec((1, C), lambda i: (0, 0)),
                pl.BlockSpec((1, C), lambda i: (0, 0)),
            ],
            out_specs=pl.BlockSpec((TM, C), lambda i: (i, 0)),
            compiler_params=pltpu.CompilerParams(
                dimension_semantics=("parallel",)),
        )(x2, weight.reshape(1, C), bias.reshape(1, C))
        return out.reshape(orig_shape)

    elif data_format == "channels_first":
        # Input (B, C, *spatial): normalize over C per spatial position.
        orig_shape = x.shape
        B, C = int(orig_shape[0]), int(orig_shape[1])
        S = 1
        for d in orig_shape[2:]:
            S *= int(d)
        x3 = x.reshape(B, C, S)

        # Keep the spatial axis on the lanes (unmasked, lane-dense stores):
        # TS is a multiple of 128 that divides S, or the full S if S isn't
        # 128-aligned (a full-extent block is always a legal shape).
        if S % 128 == 0:
            TS = min(S, 2048)
            while S % TS != 0:
                TS //= 2
        else:
            TS = S
        grid = (B, S // TS)

        out = pl.pallas_call(
            partial(_ln_channels_first_kernel, eps=eps),
            out_shape=jax.ShapeDtypeStruct((B, C, S), x.dtype),
            grid=grid,
            in_specs=[
                pl.BlockSpec((1, C, TS), lambda b, s: (b, 0, s)),
                pl.BlockSpec((C, 1), lambda b, s: (0, 0)),
                pl.BlockSpec((C, 1), lambda b, s: (0, 0)),
            ],
            out_specs=pl.BlockSpec((1, C, TS), lambda b, s: (b, 0, s)),
            compiler_params=pltpu.CompilerParams(
                dimension_semantics=("parallel", "parallel")),
        )(x3, weight.reshape(C, 1), bias.reshape(C, 1))
        return out.reshape(orig_shape)

    else:
        raise NotImplementedError(data_format)


# ----------------------------------------------------------------------------
# Pure-JAX reference reproducing the PyTorch forward
# ----------------------------------------------------------------------------
def layer_norm_ref(x, weight, bias, eps, data_format):
    x32 = x.astype(jnp.float32)
    if data_format == "channels_last":
        mean = jnp.mean(x32, axis=-1, keepdims=True)
        var = jnp.mean((x32 - mean) ** 2, axis=-1, keepdims=True)
        y = (x32 - mean) / jnp.sqrt(var + eps)
        return (y * weight + bias).astype(x.dtype)
    else:  # channels_first
        mean = jnp.mean(x32, axis=1, keepdims=True)
        var = jnp.mean((x32 - mean) ** 2, axis=1, keepdims=True)
        y = (x32 - mean) / jnp.sqrt(var + eps)
        wshape = (1, -1) + (1,) * (x.ndim - 2)
        return (y * weight.reshape(wshape) + bias.reshape(wshape)).astype(x.dtype)


# ----------------------------------------------------------------------------
# Self-test
# ----------------------------------------------------------------------------
if __name__ == "__main__":
    eps = 1e-6
    key = jax.random.PRNGKey(0)
    k1, k2, k3, k4, k5, k6 = jax.random.split(key, 6)

    # ---- channels_last: x is (B, H, W, C), normalize over C ----
    B, H, W, C = 2, 32, 16, 32                      # M = B*H*W = 1024 rows
    x_last = jax.random.normal(k1, (B, H, W, C), dtype=jnp.float32)
    w_last = 1.0 + 0.1 * jax.random.normal(k2, (C,), dtype=jnp.float32)
    b_last = 0.1 * jax.random.normal(k3, (C,), dtype=jnp.float32)

    out_last = layer_norm(x_last, w_last, b_last, eps=eps,
                          data_format="channels_last")
    out_last = jax.block_until_ready(out_last)
    ref_last = jax.block_until_ready(
        layer_norm_ref(x_last, w_last, b_last, eps, "channels_last"))
    assert out_last.shape == x_last.shape
    np.testing.assert_allclose(np.asarray(out_last), np.asarray(ref_last),
                               rtol=1e-4, atol=1e-4)

    # ---- channels_first: x is (B, C, H, W), normalize over C ----
    Bc, Cc, Hc, Wc = 2, 32, 16, 16                  # spatial S = 256 (128-aligned)
    x_first = jax.random.normal(k4, (Bc, Cc, Hc, Wc), dtype=jnp.float32)
    w_first = 1.0 + 0.1 * jax.random.normal(k5, (Cc,), dtype=jnp.float32)
    b_first = 0.1 * jax.random.normal(k6, (Cc,), dtype=jnp.float32)

    out_first = layer_norm(x_first, w_first, b_first, eps=eps,
                           data_format="channels_first")
    out_first = jax.block_until_ready(out_first)
    ref_first = jax.block_until_ready(
        layer_norm_ref(x_first, w_first, b_first, eps, "channels_first"))
    assert out_first.shape == x_first.shape
    np.testing.assert_allclose(np.asarray(out_first), np.asarray(ref_first),
                               rtol=1e-4, atol=1e-4)

    print("KERNEL_OK")
</pallas_src>

<mosaic_0001>
module attributes {stable_mosaic.version = 11 : i64} {
  func.func @_ln_channels_last_kernel(%arg0: i32, %arg1: memref<512x32xf32, #tpu.memory_space<vmem>>, %arg2: memref<1x32xf32, #tpu.memory_space<vmem>>, %arg3: memref<1x32xf32, #tpu.memory_space<vmem>>, %arg4: memref<512x32xf32, #tpu.memory_space<vmem>>) attributes {dimension_semantics = [#tpu.dimension_semantics<parallel>], iteration_bounds = array<i64: 2>, scalar_prefetch = 0 : i64, scratch_operands = 0 : i64, tpu.core_type = #tpu.core_type<tc>, window_params = [{transform_indices = @transform_0, window_bounds = array<i64: 512, 32>}, {pipeline_mode = #tpu.pipeline_mode<synchronous>, transform_indices = @transform_1, window_bounds = array<i64: 1, 32>}, {pipeline_mode = #tpu.pipeline_mode<synchronous>, transform_indices = @transform_2, window_bounds = array<i64: 1, 32>}, {transform_indices = @transform_3, window_bounds = array<i64: 512, 32>}]} {
    %c0 = arith.constant 0 : index
    %c0_0 = arith.constant 0 : index
    %0 = vector.load %arg1[%c0, %c0_0] : memref<512x32xf32, #tpu.memory_space<vmem>>, vector<512x32xf32>
    %cst = arith.constant dense<0.000000e+00> : vector<512xf32>
    %1 = vector.multi_reduction <add>, %0, %cst [1] : vector<512x32xf32> to vector<512xf32>
    %2 = vector.shape_cast %1 : vector<512xf32> to vector<512x1xf32>
    %cst_1 = arith.constant 3.200000e+01 : f32
    %3 = vector.broadcast %cst_1 : f32 to vector<512x1xf32>
    %4 = arith.divf %2, %3 : vector<512x1xf32>
    %5 = vector.broadcast %4 : vector<512x1xf32> to vector<512x32xf32>
    %6 = arith.subf %0, %5 : vector<512x32xf32>
    %7 = arith.mulf %6, %6 : vector<512x32xf32>
    %cst_2 = arith.constant dense<0.000000e+00> : vector<512xf32>
    %8 = vector.multi_reduction <add>, %7, %cst_2 [1] : vector<512x32xf32> to vector<512xf32>
    %9 = vector.shape_cast %8 : vector<512xf32> to vector<512x1xf32>
    %cst_3 = arith.constant 3.200000e+01 : f32
    %10 = vector.broadcast %cst_3 : f32 to vector<512x1xf32>
    %11 = arith.divf %9, %10 : vector<512x1xf32>
    %cst_4 = arith.constant 9.99999997E-7 : f32
    %12 = vector.broadcast %cst_4 : f32 to vector<512x1xf32>
    %13 = arith.addf %11, %12 : vector<512x1xf32>
    %14 = math.rsqrt %13 : vector<512x1xf32>
    %c0_5 = arith.constant 0 : index
    %c0_6 = arith.constant 0 : index
    %15 = vector.load %arg2[%c0_5, %c0_6] : memref<1x32xf32, #tpu.memory_space<vmem>>, vector<1x32xf32>
    %c0_7 = arith.constant 0 : index
    %c0_8 = arith.constant 0 : index
    %16 = vector.load %arg3[%c0_7, %c0_8] : memref<1x32xf32, #tpu.memory_space<vmem>>, vector<1x32xf32>
    %17 = vector.broadcast %14 : vector<512x1xf32> to vector<512x32xf32>
    %18 = arith.mulf %6, %17 : vector<512x32xf32>
    %19 = vector.broadcast %15 : vector<1x32xf32> to vector<512x32xf32>
    %20 = arith.mulf %18, %19 : vector<512x32xf32>
    %21 = vector.broadcast %16 : vector<1x32xf32> to vector<512x32xf32>
    %22 = arith.addf %20, %21 : vector<512x32xf32>
    %c0_9 = arith.constant 0 : index
    %c0_10 = arith.constant 0 : index
    %23 = vector.load %arg4[%c0_9, %c0_10] : memref<512x32xf32, #tpu.memory_space<vmem>>, vector<512x32xf32>
    tpu.vector_store %arg4[%c0_9, %c0_10], %22 {strides = array<i32>} : memref<512x32xf32, #tpu.memory_space<vmem>>, vector<512x32xf32>,
    return
  }
  func.func @transform_0(%arg0: i32) -> (i32, i32) {
    %c0_i32 = arith.constant 0 : i32
    %c0_i32_0 = arith.constant 0 : i32
    return %arg0, %c0_i32 : i32, i32
  }
  func.func @transform_1(%arg0: i32) -> (i32, i32) {
    %c0_i32 = arith.constant 0 : i32
    %c0_i32_0 = arith.constant 0 : i32
    %c0_i32_1 = arith.constant 0 : i32
    return %c0_i32, %c0_i32_0 : i32, i32
  }
  func.func @transform_2(%arg0: i32) -> (i32, i32) {
    %c0_i32 = arith.constant 0 : i32
    %c0_i32_0 = arith.constant 0 : i32
    %c0_i32_1 = arith.constant 0 : i32
    return %c0_i32, %c0_i32_0 : i32, i32
  }
  func.func @transform_3(%arg0: i32) -> (i32, i32) {
    %c0_i32 = arith.constant 0 : i32
    %c0_i32_0 = arith.constant 0 : i32
    return %arg0, %c0_i32 : i32, i32
  }
}

</mosaic_0001>

<bundles_post_ra>
// kernel: tpu_custom_call.1
= control target key start
LH: loop header
LB: loop body
LE: loop exit
PB: predicated region body
PF: predicated region fallthrough
CT: control target
= control target key end

     0   :  { %s1513_s12 = smov 0   ;;  %s2565_s0 = inlined_call_operand.vmem [shape: f32[1024,32], index: 0, kind: input, shape index: {}]   ;;  %s2566_s1 = inlined_call_operand.vmem [shape: f32[1,32], index: 1, kind: input, shape index: {}]   ;;  %s2567_s2 = inlined_call_operand.vmem [shape: f32[1,32], index: 2, kind: input, shape index: {}]   ;;  %s2568_s3 = inlined_call_operand.vmem [shape: f32[1024,32], index: 3, kind: output, shape index: {}]  }
   0x1 LB: > { %s1334_s13 = sadd.s32 4294967295, %s1491_s12   ;;  %p1338_p0 = scmp.ge.s32.totalorder %s1491_s12, 1  ;;  %s1491_s12 = sphi %s1513_s12, %s13_s12  }
   0x2   : > { %p138_p1 = scmp.lt.s32.totalorder %s1491_s12, 3 }
   0x4   : > { %p139_p2 = pnand %p1338_p0, %p138_p1 }
   0x6   : > { %142 = sbr.rel (%p139_p2) target bundleno = 462 (0x1ce), region = 32 }
   0xd   : > { %s1339_s14 = sshll.u32 %s1334_s13, 6  ;;  %vm238_vm0 = vcmask 261120  }
   0xe   : > { %p163_p3 = scmp.lt.s32.totalorder %s1339_s14, 127 }
  0x10   : > { %s2663_s14 = smov (!%p163_p3, %s1339_s14), 127 }
  0x11   : > { %s1340_s15 = sshll.u32 %s2663_s14, 3 }
  0x12   : > { %s1529_s18 = scalar_lea.vmem %s2565_s0, %s1340_s15  ;;  %s2252_s25 = scalar_lea.vmem %s2568_s3, %s1340_s15 }
  0x13   : > { %v1532_v0 = vld [vmem:[%s1529_s18] sm:$0xff]  ;;  %v1535_v1 = vld [vmem:[%s1529_s18 + $0x10] sm:$0xff]  ;;  %v1538_v2 = vld [vmem:[%s1529_s18 + $0x8] sm:$0xff] }
  0x14   : > { %v239_v3 = vsel %vm238_vm0, %v1532_v0, 0.0  ;;  %v245_v4 = vsel %vm238_vm0, %v1535_v1, 0.0  ;;  %v1545_v5 = vld [vmem:[%s1529_s18 + $0x18] sm:$0xff]  ;;  %v242_v6 = vsel %vm238_vm0, %v1538_v2, 0.0  ;;  %v1552_v8 = vld [vmem:[%s1529_s18 + $0x20] sm:$0xff]  ;;  %v1555_v9 = vld [vmem:[%s1529_s18 + $0x28] sm:$0xff] }
  0x15   : > { %240 = vadd.xlane.f32.xlu0 %v239_v3  ;;  %246 = vadd.xlane.f32.xlu1 %v245_v4  ;;  %v248_v7 = vsel %vm238_vm0, %v1545_v5, 0.0  ;;  %v251_v10 = vsel %vm238_vm0, %v1552_v8, 0.0  ;;  %v254_v11 = vsel %vm238_vm0, %v1555_v9, 0.0  ;;  %v1562_v12 = vld [vmem:[%s1529_s18 + $0x30] sm:$0xff]  ;;  %v1565_v13 = vld [vmem:[%s1529_s18 + $0x38] sm:$0xff]  ;;  %v1572_v16 = vld [vmem:[%s1529_s18 + $0x40] sm:$0xff] }
  0x16   : > { %v257_v14 = vsel %vm238_vm0, %v1562_v12, 0.0  ;;  %v260_v15 = vsel %vm238_vm0, %v1565_v13, 0.0  ;;  %v1575_v17 = vld [vmem:[%s1529_s18 + $0x48] sm:$0xff]  ;;  %v263_v18 = vsel %vm238_vm0, %v1572_v16, 0.0  ;;  %v1582_v20 = vld [vmem:[%s1529_s18 + $0x50] sm:$0xff]  ;;  %v1585_v21 = vld [vmem:[%s1529_s18 + $0x58] sm:$0xff] }
  0x17   : > { %v266_v19 = vsel %vm238_vm0, %v1575_v17, 0.0  ;;  %v269_v22 = vsel %vm238_vm0, %v1582_v20, 0.0  ;;  %v272_v23 = vsel %vm238_vm0, %v1585_v21, 0.0  ;;  %v1592_v24 = vld [vmem:[%s1529_s18 + $0x60] sm:$0xff]  ;;  %v1595_v25 = vld [vmem:[%s1529_s18 + $0x68] sm:$0xff]  ;;  %v1602_v28 = vld [vmem:[%s1529_s18 + $0x70] sm:$0xff] }
  0x18   : > { %v275_v26 = vsel %vm238_vm0, %v1592_v24, 0.0  ;;  %v278_v27 = vsel %vm238_vm0, %v1595_v25, 0.0  ;;  %v1605_v29 = vld [vmem:[%s1529_s18 + $0x78] sm:$0xff]  ;;  %v281_v30 = vsel %vm238_vm0, %v1602_v28, 0.0  ;;  %v1612_v32 = vld [vmem:[%s1529_s18 + $0x80] sm:$0xff]  ;;  %v1615_v33 = vld [vmem:[%s1529_s18 + $0x88] sm:$0xff] }
  0x19   : > { %243 = vadd.xlane.f32.xlu0 %v242_v6  ;;  %249 = vadd.xlane.f32.xlu1 %v248_v7  ;;  %v284_v31 = vsel %vm238_vm0, %v1605_v29, 0.0  ;;  %v287_v34 = vsel %vm238_vm0, %v1612_v32, 0.0  ;;  %v290_v35 = vsel %vm238_vm0, %v1615_v33, 0.0  ;;  %v1622_v36 = vld [vmem:[%s1529_s18 + $0x90] sm:$0xff]  ;;  %v1625_v37 = vld [vmem:[%s1529_s18 + $0x98] sm:$0xff]  ;;  %v1632_v40 = vld [vmem:[%s1529_s18 + $0xa0] sm:$0xff] }
  0x1a   : > { %v293_v38 = vsel %vm238_vm0, %v1622_v36, 0.0  ;;  %v296_v39 = vsel %vm238_vm0, %v1625_v37, 0.0  ;;  %v1635_v41 = vld [vmem:[%s1529_s18 + $0xa8] sm:$0xff]  ;;  %v299_v42 = vsel %vm238_vm0, %v1632_v40, 0.0  ;;  %v1642_v44 = vld [vmem:[%s1529_s18 + $0xb0] sm:$0xff]  ;;  %v1645_v45 = vld [vmem:[%s1529_s18 + $0xb8] sm:$0xff] }
  0x1b   : > { %v302_v43 = vsel %vm238_vm0, %v1635_v41, 0.0  ;;  %v305_v46 = vsel %vm238_vm0, %v1642_v44, 0.0  ;;  %v308_v47 = vsel %vm238_vm0, %v1645_v45, 0.0  ;;  %v1652_v48 = vld [vmem:[%s1529_s18 + $0xc0] sm:$0xff]  ;;  %v1655_v49 = vld [vmem:[%s1529_s18 + $0xc8] sm:$0xff]  ;;  %v1662_v52 = vld [vmem:[%s1529_s18 + $0xd0] sm:$0xff] }
  0x1c   : > { %v311_v50 = vsel %vm238_vm0, %v1652_v48, 0.0  ;;  %v314_v51 = vsel %vm238_vm0, %v1655_v49, 0.0  ;;  %v1665_v53 = vld [vmem:[%s1529_s18 + $0xd8] sm:$0xff]  ;;  %v317_v54 = vsel %vm238_vm0, %v1662_v52, 0.0  ;;  %v1672_v56 = vld [vmem:[%s1529_s18 + $0xe0] sm:$0xff]  ;;  %v1675_v57 = vld [vmem:[%s1529_s18 + $0xe8] sm:$0xff] }
  0x1d   : > { %252 = vadd.xlane.f32.xlu0 %v251_v10  ;;  %255 = vadd.xlane.f32.xlu1 %v254_v11  ;;  %v320_v55 = vsel %vm238_vm0, %v1665_v53, 0.0  ;;  %v323_v58 = vsel %vm238_vm0, %v1672_v56, 0.0  ;;  %v326_v59 = vsel %vm238_vm0, %v1675_v57, 0.0  ;;  %v1682_v60 = vld [vmem:[%s1529_s18 + $0xf0] sm:$0xff]  ;;  %v1685_v61 = vld [vmem:[%s1529_s18 + $0xf8] sm:$0xff]  ;;  %v1692_v3 = vld [vmem:[%s1529_s18 + $0x100] sm:$0xff] }
  0x1e   : > { %v329_v62 = vsel %vm238_vm0, %v1682_v60, 0.0  ;;  %v332_v63 = vsel %vm238_vm0, %v1685_v61, 0.0  ;;  %v1695_v4 = vld [vmem:[%s1529_s18 + $0x108] sm:$0xff]  ;;  %v335_v6 = vsel %vm238_vm0, %v1692_v3, 0.0  ;;  %v1702_v10 = vld [vmem:[%s1529_s18 + $0x110] sm:$0xff]  ;;  %v1705_v11 = vld [vmem:[%s1529_s18 + $0x118] sm:$0xff] }
  0x1f   : > { %v338_v7 = vsel %vm238_vm0, %v1695_v4, 0.0 }
  0x21   : > { %258 = vadd.xlane.f32.xlu0 %v257_v14  ;;  %261 = vadd.xlane.f32.xlu1 %v260_v15  ;;  %v341_v14 = vsel %vm238_vm0, %v1702_v10, 0.0  ;;  %v344_v15 = vsel %vm238_vm0, %v1705_v11, 0.0 }
  0x25   : > { %264 = vadd.xlane.f32.xlu0 %v263_v18  ;;  %267 = vadd.xlane.f32.xlu1 %v266_v19  ;;  %v1712_v18 = vld [vmem:[%s1529_s18 + $0x120] sm:$0xff]  ;;  %v1715_v19 = vld [vmem:[%s1529_s18 + $0x128] sm:$0xff] }
  0x29   : > { %270 = vadd.xlane.f32.xlu0 %v269_v22  ;;  %273 = vadd.xlane.f32.xlu1 %v272_v23  ;;  %v347_v22 = vsel %vm238_vm0, %v1712_v18, 0.0  ;;  %v350_v23 = vsel %vm238_vm0, %v1715_v19, 0.0 }
  0x2d   : > { %276 = vadd.xlane.f32.xlu0 %v275_v26  ;;  %279 = vadd.xlane.f32.xlu1 %v278_v27  ;;  %v1722_v26 = vld [vmem:[%s1529_s18 + $0x130] sm:$0xff]  ;;  %v1725_v27 = vld [vmem:[%s1529_s18 + $0x138] sm:$0xff] }
  0x31   : > { %282 = vadd.xlane.f32.xlu0 %v281_v30  ;;  %285 = vadd.xlane.f32.xlu1 %v284_v31  ;;  %v353_v30 = vsel %vm238_vm0, %v1722_v26, 0.0  ;;  %v356_v31 = vsel %vm238_vm0, %v1725_v27, 0.0 }
  0x35   : > { %288 = vadd.xlane.f32.xlu0 %v287_v34  ;;  %291 = vadd.xlane.f32.xlu1 %v290_v35  ;;  %v1732_v34 = vld [vmem:[%s1529_s18 + $0x140] sm:$0xff]  ;;  %v1735_v35 = vld [vmem:[%s1529_s18 + $0x148] sm:$0xff] }
  0x39   : > { %294 = vadd.xlane.f32.xlu0 %v293_v38  ;;  %297 = vadd.xlane.f32.xlu1 %v296_v39  ;;  %v359_v38 = vsel %vm238_vm0, %v1732_v34, 0.0  ;;  %v362_v39 = vsel %vm238_vm0, %v1735_v35, 0.0 }
  0x3d   : > { %300 = vadd.xlane.f32.xlu0 %v299_v42  ;;  %303 = vadd.xlane.f32.xlu1 %v302_v43  ;;  %v1742_v42 = vld [vmem:[%s1529_s18 + $0x150] sm:$0xff]  ;;  %v1745_v43 = vld [vmem:[%s1529_s18 + $0x158] sm:$0xff] }
  0x41   : > { %306 = vadd.xlane.f32.xlu0 %v305_v46  ;;  %309 = vadd.xlane.f32.xlu1 %v308_v47  ;;  %v365_v46 = vsel %vm238_vm0, %v1742_v42, 0.0  ;;  %v368_v47 = vsel %vm238_vm0, %v1745_v43, 0.0 }
  0x45   : > { %312 = vadd.xlane.f32.xlu0 %v311_v50  ;;  %315 = vadd.xlane.f32.xlu1 %v314_v51  ;;  %v1752_v50 = vld [vmem:[%s1529_s18 + $0x160] sm:$0xff]  ;;  %v1755_v51 = vld [vmem:[%s1529_s18 + $0x168] sm:$0xff] }
  0x49   : > { %318 = vadd.xlane.f32.xlu0 %v317_v54  ;;  %321 = vadd.xlane.f32.xlu1 %v320_v55  ;;  %v371_v54 = vsel %vm238_vm0, %v1752_v50, 0.0  ;;  %v374_v55 = vsel %vm238_vm0, %v1755_v51, 0.0 }
  0x4d   : > { %324 = vadd.xlane.f32.xlu0 %v323_v58  ;;  %327 = vadd.xlane.f32.xlu1 %v326_v59  ;;  %v1762_v58 = vld [vmem:[%s1529_s18 + $0x170] sm:$0xff]  ;;  %v1765_v59 = vld [vmem:[%s1529_s18 + $0x178] sm:$0xff] }
  0x51   : > { %330 = vadd.xlane.f32.xlu0 %v329_v62  ;;  %333 = vadd.xlane.f32.xlu1 %v332_v63  ;;  %v377_v62 = vsel %vm238_vm0, %v1762_v58, 0.0  ;;  %v380_v63 = vsel %vm238_vm0, %v1765_v59, 0.0 }
  0x55   : > { %336 = vadd.xlane.f32.xlu0 %v335_v6  ;;  %339 = vadd.xlane.f32.xlu1 %v338_v7  ;;  %v1772_v6 = vld [vmem:[%s1529_s18 + $0x180] sm:$0xff]  ;;  %v1775_v7 = vld [vmem:[%s1529_s18 + $0x188] sm:$0xff] }
  0x59   : > { %342 = vadd.xlane.f32.xlu0 %v341_v14  ;;  %345 = vadd.xlane.f32.xlu1 %v344_v15  ;;  %v383_v14 = vsel %vm238_vm0, %v1772_v6, 0.0  ;;  %v386_v15 = vsel %vm238_vm0, %v1775_v7, 0.0 }
  0x5d   : > { %348 = vadd.xlane.f32.xlu0 %v347_v22  ;;  %351 = vadd.xlane.f32.xlu1 %v350_v23  ;;  %v1782_v22 = vld [vmem:[%s1529_s18 + $0x190] sm:$0xff]  ;;  %v1785_v23 = vld [vmem:[%s1529_s18 + $0x198] sm:$0xff] }
  0x5e   : > { %2600 = vst [vmem:[#allocation2_spill] sm:$0xff] %v1782_v22  ;;  %2601 = vst [vmem:[#allocation3_spill] sm:$0xff] %v1785_v23 }
  0x61   : > { %354 = vadd.xlane.f32.xlu0 %v353_v30  ;;  %357 = vadd.xlane.f32.xlu1 %v356_v31  ;;  %v389_v30 = vsel %vm238_vm0, %v1782_v22, 0.0  ;;  %v392_v31 = vsel %vm238_vm0, %v1785_v23, 0.0 }
  0x65   : > { %360 = vadd.xlane.f32.xlu0 %v359_v38  ;;  %363 = vadd.xlane.f32.xlu1 %v362_v39  ;;  %v1792_v38 = vld [vmem:[%s1529_s18 + $0x1a0] sm:$0xff]  ;;  %v1795_v39 = vld [vmem:[%s1529_s18 + $0x1a8] sm:$0xff] }
  0x66   : > { %2602 = vst [vmem:[#allocation4_spill] sm:$0xff] %v1792_v38  ;;  %2603 = vst [vmem:[#allocation5_spill] sm:$0xff] %v1795_v39 }
  0x69   : > { %366 = vadd.xlane.f32.xlu0 %v365_v46  ;;  %369 = vadd.xlane.f32.xlu1 %v368_v47  ;;  %v395_v46 = vsel %vm238_vm0, %v1792_v38, 0.0  ;;  %v398_v47 = vsel %vm238_vm0, %v1795_v39, 0.0 }
  0x6d   : > { %372 = vadd.xlane.f32.xlu0 %v371_v54  ;;  %375 = vadd.xlane.f32.xlu1 %v374_v55  ;;  %v1802_v54 = vld [vmem:[%s1529_s18 + $0x1b0] sm:$0xff]  ;;  %v1805_v55 = vld [vmem:[%s1529_s18 + $0x1b8] sm:$0xff] }
  0x6e   : > { %2604 = vst [vmem:[#allocation6_spill] sm:$0xff] %v1802_v54  ;;  %2605 = vst [vmem:[#allocation7_spill] sm:$0xff] %v1805_v55 }
  0x71   : > { %378 = vadd.xlane.f32.xlu0 %v377_v62  ;;  %381 = vadd.xlane.f32.xlu1 %v380_v63  ;;  %v401_v62 = vsel %vm238_vm0, %v1802_v54, 0.0  ;;  %v404_v63 = vsel %vm238_vm0, %v1805_v55, 0.0  ;;  %v1835_v54 = vld [vmem:[%s1529_s18 + $0x1e8] sm:$0xff] }
  0x72   : > { %2611 = vst [vmem:[#allocation13_spill] sm:$0xff] %v1835_v54 }
  0x75   : > { %384 = vadd.xlane.f32.xlu0 %v383_v14  ;;  %387 = vadd.xlane.f32.xlu1 %v386_v15  ;;  %v1812_v14 = vld [vmem:[%s1529_s18 + $0x1c0] sm:$0xff]  ;;  %v1815_v15 = vld [vmem:[%s1529_s18 + $0x1c8] sm:$0xff] }
  0x76   : > { %2606 = vst [vmem:[#allocation8_spill] sm:$0xff] %v1812_v14  ;;  %2607 = vst [vmem:[#allocation9_spill] sm:$0xff] %v1815_v15 }
  0x79   : > { %390 = vadd.xlane.f32.xlu0 %v389_v30  ;;  %393 = vadd.xlane.f32.xlu1 %v392_v31  ;;  %v407_v30 = vsel %vm238_vm0, %v1812_v14, 0.0  ;;  %v410_v31 = vsel %vm238_vm0, %v1815_v15, 0.0  ;;  %v422_v14 = vsel %vm238_vm0, %v1835_v54, 0.0 }
  0x7d   : > { %396 = vadd.xlane.f32.xlu0 %v395_v46  ;;  %399 = vadd.xlane.f32.xlu1 %v398_v47  ;;  %v1822_v46 = vld [vmem:[%s1529_s18 + $0x1d0] sm:$0xff]  ;;  %v1825_v47 = vld [vmem:[%s1529_s18 + $0x1d8] sm:$0xff] }
  0x7e   : > { %2608 = vst [vmem:[#allocation10_spill] sm:$0xff] %v1822_v46  ;;  %2609 = vst [vmem:[#allocation11_spill] sm:$0xff] %v1825_v47  ;;  %v413_v55 = vsel %vm238_vm0, %v1822_v46, 0.0 }
  0x81   : > { %402 = vadd.xlane.f32.xlu0 %v401_v62  ;;  %405 = vadd.xlane.f32.xlu1 %v404_v63  ;;  %v416_v62 = vsel %vm238_vm0, %v1825_v47, 0.0  ;;  %v1832_v63 = vld [vmem:[%s1529_s18 + $0x1e0] sm:$0xff] }
  0x82   : > { %2610 = vst [vmem:[#allocation12_spill] sm:$0xff] %v1832_v63  ;;  %v419_v15 = vsel %vm238_vm0, %v1832_v63, 0.0 }
  0x85   : > { %408 = vadd.xlane.f32.xlu0 %v407_v30  ;;  %411 = vadd.xlane.f32.xlu1 %v410_v31  ;;  %v1842_v30 = vld [vmem:[%s1529_s18 + $0x1f0] sm:$0xff]  ;;  %v1845_v31 = vld [vmem:[%s1529_s18 + $0x1f8] sm:$0xff] }
  0x86   : > { %2612 = vst [vmem:[#allocation14_spill] sm:$0xff] %v1842_v30  ;;  %v425_v47 = vsel %vm238_vm0, %v1842_v30, 0.0  ;;  %v428_v46 = vsel %vm238_vm0, %v1845_v31, 0.0 }
  0x89   : > { %414 = vadd.xlane.f32.xlu0 %v413_v55  ;;  %417 = vadd.xlane.f32.xlu1 %v416_v62 }
  0x8d   : > { %420 = vadd.xlane.f32.xlu0 %v419_v15  ;;  %423 = vadd.xlane.f32.xlu1 %v422_v14 }
  0x91   : > { %426 = vadd.xlane.f32.xlu0 %v425_v47  ;;  %429 = vadd.xlane.f32.xlu1 %v428_v46 }
  0xa2   : > { %v241_v55 = vpop.xlane.xlu0 %240  ;;  %v247_v62 = vpop.xlane.xlu1 %246 }
  0xa3   : > { %v432_v63 = vmul.f32 0.03125, %v241_v55  ;;  %v434_v39 = vmul.f32 0.03125, %v247_v62 }
  0xa5   : > { %v1852_v54 = vsub.f32 %v1532_v0, %v432_v63  ;;  %v1855_v38 = vsub.f32 %v1535_v1, %v434_v39 }
  0xa6   : > { %v244_v15 = vpop.xlane.xlu0 %243  ;;  %v250_v14 = vpop.xlane.xlu1 %249 }
  0xa7   : > { %2613 = vst [vmem:[#allocation15_spill] sm:$0xff] %v1855_v38  ;;  %v433_v23 = vmul.f32 0.03125, %v244_v15  ;;  %v435_v22 = vmul.f32 0.03125, %v250_v14  ;;  %v560_v30 = vmul.f32 %v1852_v54, %v1852_v54  ;;  %v562_v46 = vmul.f32 %v1855_v38, %v1855_v38 }
  0xa9   : > { %v1862_v47 = vsub.f32 %v1538_v2, %v433_v23  ;;  %v1865_v55 = vsub.f32 %v1545_v5, %v435_v22  ;;  %v624_v0 = vsel %vm238_vm0, %v560_v30, 0.0  ;;  %v630_v63 = vsel %vm238_vm0, %v562_v46, 0.0 }
  0xaa   : > { %625 = vadd.xlane.f32.xlu0 %v624_v0  ;;  %v253_v1 = vpop.xlane.xlu0 %252  ;;  %v256_v39 = vpop.xlane.xlu1 %255 }
  0xab   : > { %v436_v62 = vmul.f32 0.03125, %v253_v1  ;;  %v437_v15 = vmul.f32 0.03125, %v256_v39  ;;  %v561_v14 = vmul.f32 %v1862_v47, %v1862_v47  ;;  %v563_v38 = vmul.f32 %v1865_v55, %v1865_v55 }
  0xad   : > { %v1874_v2 = vsub.f32 %v1552_v8, %v436_v62  ;;  %v1877_v5 = vsub.f32 %v1555_v9, %v437_v15  ;;  %v627_v22 = vsel %vm238_vm0, %v561_v14, 0.0  ;;  %v633_v46 = vsel %vm238_vm0, %v563_v38, 0.0 }
  0xae   : > { %631 = vadd.xlane.f32.xlu0 %v630_v63  ;;  %628 = vadd.xlane.f32.xlu1 %v627_v22  ;;  %v259_v23 = vpop.xlane.xlu0 %258  ;;  %v262_v30 = vpop.xlane.xlu1 %261 }
  0xaf   : > { %v438_v0 = vmul.f32 0.03125, %v259_v23  ;;  %v439_v1 = vmul.f32 0.03125, %v262_v30  ;;  %v564_v39 = vmul.f32 %v1874_v2, %v1874_v2  ;;  %v565_v8 = vmul.f32 %v1877_v5, %v1877_v5 }
  0xb1   : > { %v1886_v62 = vsub.f32 %v1562_v12, %v438_v0  ;;  %v1889_v9 = vsub.f32 %v1565_v13, %v439_v1  ;;  %v636_v63 = vsel %vm238_vm0, %v564_v39, 0.0  ;;  %v639_v14 = vsel %vm238_vm0, %v565_v8, 0.0 }
  0xb2   : > { %634 = vadd.xlane.f32.xlu1 %v633_v46  ;;  %637 = vadd.xlane.f32.xlu0 %v636_v63  ;;  %v265_v15 = vpop.xlane.xlu0 %264  ;;  %v268_v38 = vpop.xlane.xlu1 %267 }
  0xb3   : > { %v440_v22 = vmul.f32 0.03125, %v265_v15  ;;  %v441_v23 = vmul.f32 0.03125, %v268_v38  ;;  %v566_v30 = vmul.f32 %v1886_v62, %v1886_v62  ;;  %v567_v12 = vmul.f32 %v1889_v9, %v1889_v9 }
  0xb5   : > { %v1898_v0 = vsub.f32 %v1572_v16, %v440_v22  ;;  %v1901_v13 = vsub.f32 %v1575_v17, %v441_v23  ;;  %v642_v46 = vsel %vm238_vm0, %v566_v30, 0.0  ;;  %v645_v8 = vsel %vm238_vm0, %v567_v12, 0.0 }
  0xb6   : > { %640 = vadd.xlane.f32.xlu1 %v639_v14  ;;  %643 = vadd.xlane.f32.xlu0 %v642_v46  ;;  %v271_v1 = vpop.xlane.xlu0 %270  ;;  %v274_v39 = vpop.xlane.xlu1 %273 }
  0xb7   : > { %v442_v63 = vmul.f32 0.03125, %v271_v1  ;;  %v443_v15 = vmul.f32 0.03125, %v274_v39  ;;  %v568_v38 = vmul.f32 %v1898_v0, %v1898_v0  ;;  %v569_v16 = vmul.f32 %v1901_v13, %v1901_v13 }
  0xb9   : > { %v1910_v22 = vsub.f32 %v1582_v20, %v442_v63  ;;  %v1913_v17 = vsub.f32 %v1585_v21, %v443_v15  ;;  %v648_v14 = vsel %vm238_vm0, %v568_v38, 0.0  ;;  %v651_v12 = vsel %vm238_vm0, %v569_v16, 0.0 }
  0xba   : > { %646 = vadd.xlane.f32.xlu1 %v645_v8  ;;  %649 = vadd.xlane.f32.xlu0 %v648_v14  ;;  %v277_v23 = vpop.xlane.xlu0 %276  ;;  %v280_v30 = vpop.xlane.xlu1 %279 }
  0xbb   : > { %v444_v46 = vmul.f32 0.03125, %v277_v23  ;;  %v445_v1 = vmul.f32 0.03125, %v280_v30  ;;  %v570_v39 = vmul.f32 %v1910_v22, %v1910_v22  ;;  %v571_v20 = vmul.f32 %v1913_v17, %v1913_v17 }
  0xbd   : > { %v1922_v63 = vsub.f32 %v1592_v24, %v444_v46  ;;  %v1925_v21 = vsub.f32 %v1595_v25, %v445_v1  ;;  %v654_v8 = vsel %vm238_vm0, %v570_v39, 0.0  ;;  %v657_v16 = vsel %vm238_vm0, %v571_v20, 0.0 }
  0xbe   : > { %652 = vadd.xlane.f32.xlu1 %v651_v12  ;;  %655 = vadd.xlane.f32.xlu0 %v654_v8  ;;  %v283_v15 = vpop.xlane.xlu0 %282  ;;  %v286_v38 = vpop.xlane.xlu1 %285 }
  0xbf   : > { %v446_v14 = vmul.f32 0.03125, %v283_v15  ;;  %v447_v23 = vmul.f32 0.03125, %v286_v38  ;;  %v572_v30 = vmul.f32 %v1922_v63, %v1922_v63  ;;  %v573_v24 = vmul.f32 %v1925_v21, %v1925_v21 }
  0xc1   : > { %v1934_v46 = vsub.f32 %v1602_v28, %v446_v14  ;;  %v1937_v25 = vsub.f32 %v1605_v29, %v447_v23  ;;  %v660_v12 = vsel %vm238_vm0, %v572_v30, 0.0  ;;  %v663_v20 = vsel %vm238_vm0, %v573_v24, 0.0 }
  0xc2   : > { %658 = vadd.xlane.f32.xlu1 %v657_v16  ;;  %661 = vadd.xlane.f32.xlu0 %v660_v12  ;;  %v289_v1 = vpop.xlane.xlu0 %288  ;;  %v292_v39 = vpop.xlane.xlu1 %291 }
  0xc3   : > { %v448_v8 = vmul.f32 0.03125, %v289_v1  ;;  %v449_v15 = vmul.f32 0.03125, %v292_v39  ;;  %v574_v38 = vmul.f32 %v1934_v46, %v1934_v46  ;;  %v575_v28 = vmul.f32 %v1937_v25, %v1937_v25 }
  0xc5   : > { %v1946_v14 = vsub.f32 %v1612_v32, %v448_v8  ;;  %v1949_v29 = vsub.f32 %v1615_v33, %v449_v15  ;;  %v666_v16 = vsel %vm238_vm0, %v574_v38, 0.0  ;;  %v669_v24 = vsel %vm238_vm0, %v575_v28, 0.0 }
  0xc6   : > { %664 = vadd.xlane.f32.xlu1 %v663_v20  ;;  %667 = vadd.xlane.f32.xlu0 %v666_v16  ;;  %v295_v23 = vpop.xlane.xlu0 %294  ;;  %v298_v30 = vpop.xlane.xlu1 %297 }
  0xc7   : > { %v450_v12 = vmul.f32 0.03125, %v295_v23  ;;  %v451_v1 = vmul.f32 0.03125, %v298_v30  ;;  %v576_v39 = vmul.f32 %v1946_v14, %v1946_v14  ;;  %v577_v32 = vmul.f32 %v1949_v29, %v1949_v29 }
  0xc9   : > { %v1958_v8 = vsub.f32 %v1622_v36, %v450_v12  ;;  %v1961_v33 = vsub.f32 %v1625_v37, %v451_v1  ;;  %v672_v20 = vsel %vm238_vm0, %v576_v39, 0.0  ;;  %v675_v28 = vsel %vm238_vm0, %v577_v32, 0.0 }
  0xca   : > { %670 = vadd.xlane.f32.xlu1 %v669_v24  ;;  %673 = vadd.xlane.f32.xlu0 %v672_v20  ;;  %v301_v15 = vpop.xlane.xlu0 %300  ;;  %v304_v38 = vpop.xlane.xlu1 %303 }
  0xcb   : > { %v452_v16 = vmul.f32 0.03125, %v301_v15  ;;  %v453_v23 = vmul.f32 0.03125, %v304_v38  ;;  %v578_v30 = vmul.f32 %v1958_v8, %v1958_v8  ;;  %v579_v36 = vmul.f32 %v1961_v33, %v1961_v33 }
  0xcd   : > { %v1970_v12 = vsub.f32 %v1632_v40, %v452_v16  ;;  %v1973_v37 = vsub.f32 %v1635_v41, %v453_v23  ;;  %v678_v24 = vsel %vm238_vm0, %v578_v30, 0.0  ;;  %v681_v32 = vsel %vm238_vm0, %v579_v36, 0.0 }
  0xce   : > { %676 = vadd.xlane.f32.xlu1 %v675_v28  ;;  %679 = vadd.xlane.f32.xlu0 %v678_v24  ;;  %v307_v1 = vpop.xlane.xlu0 %306  ;;  %v310_v39 = vpop.xlane.xlu1 %309 }
  0xcf   : > { %v454_v20 = vmul.f32 0.03125, %v307_v1  ;;  %v455_v15 = vmul.f32 0.03125, %v310_v39  ;;  %v580_v38 = vmul.f32 %v1970_v12, %v1970_v12  ;;  %v581_v40 = vmul.f32 %v1973_v37, %v1973_v37 }
  0xd1   : > { %v1982_v16 = vsub.f32 %v1642_v44, %v454_v20  ;;  %v1985_v41 = vsub.f32 %v1645_v45, %v455_v15  ;;  %v684_v28 = vsel %vm238_vm0, %v580_v38, 0.0  ;;  %v687_v36 = vsel %vm238_vm0, %v581_v40, 0.0 }
  0xd2   : > { %682 = vadd.xlane.f32.xlu1 %v681_v32  ;;  %685 = vadd.xlane.f32.xlu0 %v684_v28  ;;  %v313_v23 = vpop.xlane.xlu0 %312  ;;  %v316_v30 = vpop.xlane.xlu1 %315 }
  0xd3   : > { %v456_v24 = vmul.f32 0.03125, %v313_v23  ;;  %v457_v1 = vmul.f32 0.03125, %v316_v30  ;;  %v582_v39 = vmul.f32 %v1982_v16, %v1982_v16  ;;  %v583_v44 = vmul.f32 %v1985_v41, %v1985_v41 }
  0xd5   : > { %v1994_v20 = vsub.f32 %v1652_v48, %v456_v24  ;;  %v1997_v45 = vsub.f32 %v1655_v49, %v457_v1  ;;  %v690_v32 = vsel %vm238_vm0, %v582_v39, 0.0  ;;  %v693_v40 = vsel %vm238_vm0, %v583_v44, 0.0 }
  0xd6   : > { %688 = vadd.xlane.f32.xlu1 %v687_v36  ;;  %691 = vadd.xlane.f32.xlu0 %v690_v32  ;;  %v319_v15 = vpop.xlane.xlu0 %318  ;;  %v322_v38 = vpop.xlane.xlu1 %321 }
  0xd7   : > { %v458_v28 = vmul.f32 0.03125, %v319_v15  ;;  %v459_v23 = vmul.f32 0.03125, %v322_v38  ;;  %v584_v30 = vmul.f32 %v1994_v20, %v1994_v20  ;;  %v585_v48 = vmul.f32 %v1997_v45, %v1997_v45 }
  0xd9   : > { %v2006_v24 = vsub.f32 %v1662_v52, %v458_v28  ;;  %v2009_v49 = vsub.f32 %v1665_v53, %v459_v23  ;;  %v696_v36 = vsel %vm238_vm0, %v584_v30, 0.0  ;;  %v699_v44 = vsel %vm238_vm0, %v585_v48, 0.0 }
  0xda   : > { %694 = vadd.xlane.f32.xlu1 %v693_v40  ;;  %697 = vadd.xlane.f32.xlu0 %v696_v36  ;;  %v325_v1 = vpop.xlane.xlu0 %324  ;;  %v328_v39 = vpop.xlane.xlu1 %327 }
  0xdb   : > { %v460_v32 = vmul.f32 0.03125, %v325_v1  ;;  %v461_v15 = vmul.f32 0.03125, %v328_v39  ;;  %v586_v38 = vmul.f32 %v2006_v24, %v2006_v24  ;;  %v587_v52 = vmul.f32 %v2009_v49, %v2009_v49 }
  0xdd   : > { %v2018_v28 = vsub.f32 %v1672_v56, %v460_v32  ;;  %v2021_v53 = vsub.f32 %v1675_v57, %v461_v15  ;;  %v702_v40 = vsel %vm238_vm0, %v586_v38, 0.0  ;;  %v705_v48 = vsel %vm238_vm0, %v587_v52, 0.0 }
  0xde   : > { %700 = vadd.xlane.f32.xlu1 %v699_v44  ;;  %703 = vadd.xlane.f32.xlu0 %v702_v40  ;;  %v331_v23 = vpop.xlane.xlu0 %330  ;;  %v334_v30 = vpop.xlane.xlu1 %333 }
  0xdf   : > { %v462_v36 = vmul.f32 0.03125, %v331_v23  ;;  %v463_v1 = vmul.f32 0.03125, %v334_v30  ;;  %v588_v39 = vmul.f32 %v2018_v28, %v2018_v28  ;;  %v589_v56 = vmul.f32 %v2021_v53, %v2021_v53 }
  0xe1   : > { %v2030_v32 = vsub.f32 %v1682_v60, %v462_v36  ;;  %v2033_v57 = vsub.f32 %v1685_v61, %v463_v1  ;;  %v708_v44 = vsel %vm238_vm0, %v588_v39, 0.0  ;;  %v711_v52 = vsel %vm238_vm0, %v589_v56, 0.0 }
  0xe2   : > { %706 = vadd.xlane.f32.xlu1 %v705_v48  ;;  %709 = vadd.xlane.f32.xlu0 %v708_v44  ;;  %v337_v15 = vpop.xlane.xlu0 %336  ;;  %v340_v38 = vpop.xlane.xlu1 %339 }
  0xe3   : > { %v464_v40 = vmul.f32 0.03125, %v337_v15  ;;  %v465_v23 = vmul.f32 0.03125, %v340_v38  ;;  %v590_v30 = vmul.f32 %v2030_v32, %v2030_v32  ;;  %v591_v60 = vmul.f32 %v2033_v57, %v2033_v57 }
  0xe5   : > { %v2042_v36 = vsub.f32 %v1692_v3, %v464_v40  ;;  %v2045_v61 = vsub.f32 %v1695_v4, %v465_v23  ;;  %v714_v48 = vsel %vm238_vm0, %v590_v30, 0.0  ;;  %v717_v56 = vsel %vm238_vm0, %v591_v60, 0.0 }
  0xe6   : > { %712 = vadd.xlane.f32.xlu1 %v711_v52  ;;  %715 = vadd.xlane.f32.xlu0 %v714_v48  ;;  %v343_v1 = vpop.xlane.xlu0 %342  ;;  %v346_v39 = vpop.xlane.xlu1 %345 }
  0xe7   : > { %v466_v44 = vmul.f32 0.03125, %v343_v1  ;;  %v467_v15 = vmul.f32 0.03125, %v346_v39  ;;  %v592_v38 = vmul.f32 %v2042_v36, %v2042_v36  ;;  %v593_v3 = vmul.f32 %v2045_v61, %v2045_v61 }
  0xe9   : > { %v2054_v40 = vsub.f32 %v1702_v10, %v466_v44  ;;  %v2057_v4 = vsub.f32 %v1705_v11, %v467_v15  ;;  %v720_v52 = vsel %vm238_vm0, %v592_v38, 0.0  ;;  %v723_v60 = vsel %vm238_vm0, %v593_v3, 0.0 }
  0xea   : > { %718 = vadd.xlane.f32.xlu1 %v717_v56  ;;  %721 = vadd.xlane.f32.xlu0 %v720_v52  ;;  %v349_v23 = vpop.xlane.xlu0 %348  ;;  %v352_v30 = vpop.xlane.xlu1 %351 }
  0xeb   : > { %v468_v48 = vmul.f32 0.03125, %v349_v23  ;;  %v469_v1 = vmul.f32 0.03125, %v352_v30  ;;  %v594_v39 = vmul.f32 %v2054_v40, %v2054_v40  ;;  %v595_v10 = vmul.f32 %v2057_v4, %v2057_v4 }
  0xed   : > { %v2066_v44 = vsub.f32 %v1712_v18, %v468_v48  ;;  %v2069_v11 = vsub.f32 %v1715_v19, %v469_v1  ;;  %v726_v56 = vsel %vm238_vm0, %v594_v39, 0.0  ;;  %v729_v3 = vsel %vm238_vm0, %v595_v10, 0.0 }
  0xee   : > { %724 = vadd.xlane.f32.xlu1 %v723_v60  ;;  %727 = vadd.xlane.f32.xlu0 %v726_v56  ;;  %v355_v15 = vpop.xlane.xlu0 %354  ;;  %v358_v38 = vpop.xlane.xlu1 %357 }
  0xef   : > { %v470_v52 = vmul.f32 0.03125, %v355_v15  ;;  %v471_v23 = vmul.f32 0.03125, %v358_v38  ;;  %v596_v30 = vmul.f32 %v2066_v44, %v2066_v44  ;;  %v597_v18 = vmul.f32 %v2069_v11, %v2069_v11 }
  0xf1   : > { %v2078_v48 = vsub.f32 %v1722_v26, %v470_v52  ;;  %v2081_v19 = vsub.f32 %v1725_v27, %v471_v23  ;;  %v732_v60 = vsel %vm238_vm0, %v596_v30, 0.0  ;;  %v735_v10 = vsel %vm238_vm0, %v597_v18, 0.0 }
  0xf2   : > { %730 = vadd.xlane.f32.xlu1 %v729_v3  ;;  %733 = vadd.xlane.f32.xlu0 %v732_v60  ;;  %v361_v1 = vpop.xlane.xlu0 %360  ;;  %v364_v39 = vpop.xlane.xlu1 %363 }
  0xf3   : > { %v472_v56 = vmul.f32 0.03125, %v361_v1  ;;  %v473_v15 = vmul.f32 0.03125, %v364_v39  ;;  %v598_v38 = vmul.f32 %v2078_v48, %v2078_v48  ;;  %v599_v26 = vmul.f32 %v2081_v19, %v2081_v19 }
  0xf5   : > { %v2090_v52 = vsub.f32 %v1732_v34, %v472_v56  ;;  %v2093_v27 = vsub.f32 %v1735_v35, %v473_v15  ;;  %v738_v3 = vsel %vm238_vm0, %v598_v38, 0.0  ;;  %v741_v18 = vsel %vm238_vm0, %v599_v26, 0.0 }
  0xf6   : > { %736 = vadd.xlane.f32.xlu1 %v735_v10  ;;  %739 = vadd.xlane.f32.xlu0 %v738_v3  ;;  %v367_v23 = vpop.xlane.xlu0 %366  ;;  %v370_v30 = vpop.xlane.xlu1 %369 }
  0xf7   : > { %v474_v60 = vmul.f32 0.03125, %v367_v23  ;;  %v475_v1 = vmul.f32 0.03125, %v370_v30  ;;  %v600_v39 = vmul.f32 %v2090_v52, %v2090_v52  ;;  %v601_v34 = vmul.f32 %v2093_v27, %v2093_v27 }
  0xf9   : > { %v2102_v56 = vsub.f32 %v1742_v42, %v474_v60  ;;  %v2105_v35 = vsub.f32 %v1745_v43, %v475_v1  ;;  %v744_v10 = vsel %vm238_vm0, %v600_v39, 0.0  ;;  %v747_v26 = vsel %vm238_vm0, %v601_v34, 0.0 }
  0xfa   : > { %742 = vadd.xlane.f32.xlu1 %v741_v18  ;;  %745 = vadd.xlane.f32.xlu0 %v744_v10  ;;  %v373_v15 = vpop.xlane.xlu0 %372  ;;  %v376_v38 = vpop.xlane.xlu1 %375 }
  0xfb   : > { %v476_v3 = vmul.f32 0.03125, %v373_v15  ;;  %v477_v23 = vmul.f32 0.03125, %v376_v38  ;;  %v602_v30 = vmul.f32 %v2102_v56, %v2102_v56  ;;  %v603_v42 = vmul.f32 %v2105_v35, %v2105_v35 }
  0xfd   : > { %v2114_v60 = vsub.f32 %v1752_v50, %v476_v3  ;;  %v2117_v43 = vsub.f32 %v1755_v51, %v477_v23  ;;  %v750_v18 = vsel %vm238_vm0, %v602_v30, 0.0  ;;  %v753_v34 = vsel %vm238_vm0, %v603_v42, 0.0 }
  0xfe   : > { %748 = vadd.xlane.f32.xlu1 %v747_v26  ;;  %751 = vadd.xlane.f32.xlu0 %v750_v18  ;;  %v379_v1 = vpop.xlane.xlu0 %378  ;;  %v382_v39 = vpop.xlane.xlu1 %381 }
  0xff   : > { %v478_v10 = vmul.f32 0.03125, %v379_v1  ;;  %v479_v15 = vmul.f32 0.03125, %v382_v39  ;;  %v604_v38 = vmul.f32 %v2114_v60, %v2114_v60  ;;  %v605_v50 = vmul.f32 %v2117_v43, %v2117_v43 }
 0x101   : > { %v2126_v3 = vsub.f32 %v1762_v58, %v478_v10  ;;  %v2129_v51 = vsub.f32 %v1765_v59, %v479_v15  ;;  %v756_v26 = vsel %vm238_vm0, %v604_v38, 0.0  ;;  %v759_v42 = vsel %vm238_vm0, %v605_v50, 0.0 }
 0x102   : > { %754 = vadd.xlane.f32.xlu1 %v753_v34  ;;  %757 = vadd.xlane.f32.xlu0 %v756_v26  ;;  %v385_v23 = vpop.xlane.xlu0 %384  ;;  %v388_v30 = vpop.xlane.xlu1 %387 }
 0x103   : > { %2614 = vst [vmem:[#allocation16_spill] sm:$0xff] %v2129_v51  ;;  %v480_v18 = vmul.f32 0.03125, %v385_v23  ;;  %v481_v1 = vmul.f32 0.03125, %v388_v30  ;;  %v606_v39 = vmul.f32 %v2126_v3, %v2126_v3  ;;  %v607_v58 = vmul.f32 %v2129_v51, %v2129_v51 }
 0x105   : > { %v2138_v10 = vsub.f32 %v1772_v6, %v480_v18  ;;  %v2141_v59 = vsub.f32 %v1775_v7, %v481_v1  ;;  %v762_v34 = vsel %vm238_vm0, %v606_v39, 0.0  ;;  %v765_v50 = vsel %vm238_vm0, %v607_v58, 0.0  ;;  %v2617_v18 = vld [vmem:[#allocation2_spill] sm:$0xff]  ;;  %v2619_v7 = vld [vmem:[#allocation3_spill] sm:$0xff] }
 0x106   : > { %760 = vadd.xlane.f32.xlu1 %v759_v42  ;;  %763 = vadd.xlane.f32.xlu0 %v762_v34  ;;  %v391_v15 = vpop.xlane.xlu0 %390  ;;  %v394_v38 = vpop.xlane.xlu1 %393 }
 0x107   : > { %2615 = vst [vmem:[#allocation17_spill] sm:$0xff] %v2138_v10  ;;  %2616 = vst [vmem:[#allocation18_spill] sm:$0xff] %v2141_v59  ;;  %v482_v26 = vmul.f32 0.03125, %v391_v15  ;;  %v483_v23 = vmul.f32 0.03125, %v394_v38  ;;  %v608_v30 = vmul.f32 %v2138_v10, %v2138_v10  ;;  %v609_v6 = vmul.f32 %v2141_v59, %v2141_v59 }
 0x109   : > { %v2150_v51 = vsub.f32 %v2617_v18, %v482_v26  ;;  %v2153_v1 = vsub.f32 %v2619_v7, %v483_v23  ;;  %v768_v42 = vsel %vm238_vm0, %v608_v30, 0.0  ;;  %v771_v34 = vsel %vm238_vm0, %v609_v6, 0.0  ;;  %v2621_v18 = vld [vmem:[#allocation4_spill] sm:$0xff]  ;;  %v2623_v23 = vld [vmem:[#allocation5_spill] sm:$0xff] }
 0x10a   : > { %766 = vadd.xlane.f32.xlu1 %v765_v50  ;;  %769 = vadd.xlane.f32.xlu0 %v768_v42  ;;  %v397_v39 = vpop.xlane.xlu0 %396  ;;  %v400_v58 = vpop.xlane.xlu1 %399 }
 0x10b   : > { %2618 = vst [vmem:[#allocation2_spill] sm:$0xff] %v2150_v51  ;;  %2620 = vst [vmem:[#allocation3_spill] sm:$0xff] %v2153_v1  ;;  %v484_v15 = vmul.f32 0.03125, %v397_v39  ;;  %v485_v38 = vmul.f32 0.03125, %v400_v58  ;;  %v610_v10 = vmul.f32 %v2150_v51, %v2150_v51  ;;  %v611_v26 = vmul.f32 %v2153_v1, %v2153_v1 }
 0x10d   : > { %v2162_v59 = vsub.f32 %v2621_v18, %v484_v15  ;;  %v2165_v7 = vsub.f32 %v2623_v23, %v485_v38  ;;  %v774_v50 = vsel %vm238_vm0, %v610_v10, 0.0  ;;  %v777_v42 = vsel %vm238_vm0, %v611_v26, 0.0  ;;  %v2625_v18 = vld [vmem:[#allocation6_spill] sm:$0xff]  ;;  %v2627_v38 = vld [vmem:[#allocation7_spill] sm:$0xff] }
 0x10e   : > { %772 = vadd.xlane.f32.xlu1 %v771_v34  ;;  %775 = vadd.xlane.f32.xlu0 %v774_v50  ;;  %v403_v30 = vpop.xlane.xlu0 %402  ;;  %v406_v6 = vpop.xlane.xlu1 %405 }
 0x10f   : > { %2622 = vst [vmem:[#allocation4_spill] sm:$0xff] %v2162_v59  ;;  %2624 = vst [vmem:[#allocation5_spill] sm:$0xff] %v2165_v7  ;;  %v486_v39 = vmul.f32 0.03125, %v403_v30  ;;  %v487_v58 = vmul.f32 0.03125, %v406_v6  ;;  %v612_v51 = vmul.f32 %v2162_v59, %v2162_v59  ;;  %v613_v15 = vmul.f32 %v2165_v7, %v2165_v7 }
 0x111   : > { %v2174_v1 = vsub.f32 %v2625_v18, %v486_v39  ;;  %v2177_v23 = vsub.f32 %v2627_v38, %v487_v58  ;;  %v780_v10 = vsel %vm238_vm0, %v612_v51, 0.0  ;;  %v783_v50 = vsel %vm238_vm0, %v613_v15, 0.0  ;;  %v2629_v18 = vld [vmem:[#allocation8_spill] sm:$0xff]  ;;  %v2631_v58 = vld [vmem:[#allocation9_spill] sm:$0xff] }
 0x112   : > { %778 = vadd.xlane.f32.xlu1 %v777_v42  ;;  %781 = vadd.xlane.f32.xlu0 %v780_v10  ;;  %v409_v34 = vpop.xlane.xlu0 %408  ;;  %v412_v26 = vpop.xlane.xlu1 %411 }
 0x113   : > { %2626 = vst [vmem:[#allocation6_spill] sm:$0xff] %v2174_v1  ;;  %2628 = vst [vmem:[#allocation7_spill] sm:$0xff] %v2177_v23  ;;  %v488_v30 = vmul.f32 0.03125, %v409_v34  ;;  %v489_v6 = vmul.f32 0.03125, %v412_v26  ;;  %v614_v59 = vmul.f32 %v2174_v1, %v2174_v1  ;;  %v615_v39 = vmul.f32 %v2177_v23, %v2177_v23 }
 0x115   : > { %v2186_v7 = vsub.f32 %v2629_v18, %v488_v30  ;;  %v2189_v38 = vsub.f32 %v2631_v58, %v489_v6  ;;  %v786_v51 = vsel %vm238_vm0, %v614_v59, 0.0  ;;  %v789_v10 = vsel %vm238_vm0, %v615_v39, 0.0  ;;  %v2633_v18 = vld [vmem:[#allocation10_spill] sm:$0xff]  ;;  %v2635_v6 = vld [vmem:[#allocation11_spill] sm:$0xff] }
 0x116   : > { %784 = vadd.xlane.f32.xlu1 %v783_v50  ;;  %787 = vadd.xlane.f32.xlu0 %v786_v51  ;;  %v415_v42 = vpop.xlane.xlu0 %414  ;;  %v418_v15 = vpop.xlane.xlu1 %417 }
 0x117   : > { %2630 = vst [vmem:[#allocation8_spill] sm:$0xff] %v2186_v7  ;;  %2632 = vst [vmem:[#allocation9_spill] sm:$0xff] %v2189_v38  ;;  %v490_v34 = vmul.f32 0.03125, %v415_v42  ;;  %v491_v26 = vmul.f32 0.03125, %v418_v15  ;;  %v616_v1 = vmul.f32 %v2186_v7, %v2186_v7  ;;  %v617_v30 = vmul.f32 %v2189_v38, %v2189_v38 }
 0x119   : > { %v2198_v23 = vsub.f32 %v2633_v18, %v490_v34  ;;  %v2201_v58 = vsub.f32 %v2635_v6, %v491_v26  ;;  %v792_v59 = vsel %vm238_vm0, %v616_v1, 0.0  ;;  %v795_v51 = vsel %vm238_vm0, %v617_v30, 0.0  ;;  %v2637_v18 = vld [vmem:[#allocation12_spill] sm:$0xff]  ;;  %v2639_v26 = vld [vmem:[#allocation13_spill] sm:$0xff] }
 0x11a   : > { %790 = vadd.xlane.f32.xlu1 %v789_v10  ;;  %793 = vadd.xlane.f32.xlu0 %v792_v59  ;;  %v421_v50 = vpop.xlane.xlu0 %420  ;;  %v424_v39 = vpop.xlane.xlu1 %423 }
 0x11b   : > { %2634 = vst [vmem:[#allocation10_spill] sm:$0xff] %v2198_v23  ;;  %2636 = vst [vmem:[#allocation11_spill] sm:$0xff] %v2201_v58  ;;  %v492_v42 = vmul.f32 0.03125, %v421_v50  ;;  %v493_v15 = vmul.f32 0.03125, %v424_v39  ;;  %v618_v7 = vmul.f32 %v2198_v23, %v2198_v23  ;;  %v619_v34 = vmul.f32 %v2201_v58, %v2201_v58 }
 0x11d   : > { %v2210_v38 = vsub.f32 %v2637_v18, %v492_v42  ;;  %v2213_v6 = vsub.f32 %v2639_v26, %v493_v15  ;;  %v798_v1 = vsel %vm238_vm0, %v618_v7, 0.0  ;;  %v801_v59 = vsel %vm238_vm0, %v619_v34, 0.0  ;;  %v2641_v18 = vld [vmem:[#allocation14_spill] sm:$0xff] }
 0x11e   : > { %796 = vadd.xlane.f32.xlu1 %v795_v51  ;;  %799 = vadd.xlane.f32.xlu0 %v798_v1  ;;  %v427_v10 = vpop.xlane.xlu0 %426  ;;  %v430_v30 = vpop.xlane.xlu1 %429 }
 0x11f   : > { %2638 = vst [vmem:[#allocation12_spill] sm:$0xff] %v2210_v38  ;;  %2640 = vst [vmem:[#allocation13_spill] sm:$0xff] %v2213_v6  ;;  %v494_v50 = vmul.f32 0.03125, %v427_v10  ;;  %v495_v39 = vmul.f32 0.03125, %v430_v30  ;;  %v620_v23 = vmul.f32 %v2210_v38, %v2210_v38  ;;  %v621_v42 = vmul.f32 %v2213_v6, %v2213_v6 }
 0x121   : > { %v2222_v58 = vsub.f32 %v2641_v18, %v494_v50  ;;  %v2225_v15 = vsub.f32 %v1845_v31, %v495_v39  ;;  %v804_v7 = vsel %vm238_vm0, %v620_v23, 0.0  ;;  %v807_v51 = vsel %vm238_vm0, %v621_v42, 0.0 }
 0x122   : > { %802 = vadd.xlane.f32.xlu1 %v801_v59  ;;  %805 = vadd.xlane.f32.xlu0 %v804_v7 }
 0x123   : > { %2642 = vst [vmem:[#allocation14_spill] sm:$0xff] %v2222_v58  ;;  %2643 = vst [vmem:[#allocation19_spill] sm:$0xff] %v2225_v15  ;;  %v622_v34 = vmul.f32 %v2222_v58, %v2222_v58  ;;  %v623_v26 = vmul.f32 %v2225_v15, %v2225_v15 }
 0x125   : > { %v810_v1 = vsel %vm238_vm0, %v622_v34, 0.0  ;;  %v813_v10 = vsel %vm238_vm0, %v623_v26, 0.0 }
 0x126   : > { %808 = vadd.xlane.f32.xlu1 %v807_v51  ;;  %811 = vadd.xlane.f32.xlu0 %v810_v1 }
 0x12a   : > { %814 = vadd.xlane.f32.xlu1 %v813_v10 }
 0x137   : > { %v626_v31 = vpop.xlane.xlu0 %625 }
 0x138   : > { %v816_v30 = vmul.f32 0.03125, %v626_v31 }
 0x13a   : > { %v880_v23 = vadd.f32 1e-06, %v816_v30 }
 0x13b   : > { %v629_v59 = vpop.xlane.xlu1 %628  ;;  %v632_v50 = vpop.xlane.xlu0 %631 }
 0x13c   : > { %1355 = vrsqrt.f32 %v880_v23  ;;  %v817_v39 = vmul.f32 0.03125, %v629_v59  ;;  %v818_v42 = vmul.f32 0.03125, %v632_v50  ;;  %v2238_v59 = vld [vmem:[%s2566_s1] ss:$0 sm:$0xff] }
 0x13e   : > { %v881_v18 = vadd.f32 1e-06, %v817_v39  ;;  %v882_v7 = vadd.f32 1e-06, %v818_v42  ;;  %v2244_v42 = vld [vmem:[%s2567_s2] ss:$0 sm:$0xff] }
 0x13f   : > { %v635_v58 = vpop.xlane.xlu1 %634  ;;  %v638_v6 = vpop.xlane.xlu0 %637 }
 0x140   : > { %1357 = vrsqrt.f32 %v881_v18  ;;  %v819_v15 = vmul.f32 0.03125, %v635_v58  ;;  %v820_v34 = vmul.f32 0.03125, %v638_v6 }
 0x141   : > { %1359 = vrsqrt.f32 %v882_v7 }
 0x142   : > { %v883_v51 = vadd.f32 1e-06, %v819_v15  ;;  %v884_v1 = vadd.f32 1e-06, %v820_v34 }
 0x143   : > { %v641_v26 = vpop.xlane.xlu1 %640  ;;  %v644_v10 = vpop.xlane.xlu0 %643 }
 0x144   : > { %1361 = vrsqrt.f32 %v883_v51  ;;  %v821_v31 = vmul.f32 0.03125, %v641_v26  ;;  %v822_v30 = vmul.f32 0.03125, %v644_v10 }
 0x145   : > { %1363 = vrsqrt.f32 %v884_v1 }
 0x146   : > { %v1356_v23 = vpop.eup %1355  ;;  %v885_v50 = vadd.f32 1e-06, %v821_v31  ;;  %v886_v39 = vadd.f32 1e-06, %v822_v30 }
 0x147   : > { %v1010_v58 = vmul.f32 %v1356_v23, %v1852_v54  ;;  %v647_v6 = vpop.xlane.xlu1 %646  ;;  %v650_v15 = vpop.xlane.xlu0 %649 }
 0x148   : > { %1365 = vrsqrt.f32 %v885_v50  ;;  %v823_v18 = vmul.f32 0.03125, %v647_v6  ;;  %v824_v7 = vmul.f32 0.03125, %v650_v15  ;;  %v2644_v50 = vld [vmem:[#allocation15_spill] sm:$0xff] }
 0x149   : > { %v1080_v34 = vmul.f32 %v2238_v59, %v1010_v58  ;;  %1367 = vrsqrt.f32 %v886_v39 }
 0x14a   : > { %v1358_v51 = vpop.eup %1357  ;;  %v887_v54 = vadd.f32 1e-06, %v823_v18  ;;  %v888_v1 = vadd.f32 1e-06, %v824_v7 }
 0x14b   : > { %v1360_v26 = vpop.eup %1359  ;;  %v1150_v10 = vadd.f32 %v2244_v42, %v1080_v34  ;;  %v1011_v31 = vmul.f32 %v1358_v51, %v1862_v47  ;;  %v653_v30 = vpop.xlane.xlu1 %652 }
 0x14c   : > { %v656_v23 = vpop.xlane.xlu0 %655  ;;  %v1012_v58 = vmul.f32 %v1360_v26, %v2644_v50  ;;  %1369 = vrsqrt.f32 %v887_v54  ;;  %v825_v39 = vmul.f32 0.03125, %v653_v30 }
 0x14d   : > { %v826_v6 = vmul.f32 0.03125, %v656_v23  ;;  %1214 = vst.msk [vmem:[%s2252_s25] sm:$0xff] %vm238_vm0, %v1150_v10  ;;  %v1081_v15 = vmul.f32 %v2238_v59, %v1011_v31  ;;  %1371 = vrsqrt.f32 %v888_v1 }
 0x14e   : > { %v1362_v18 = vpop.eup %1361  ;;  %v1082_v7 = vmul.f32 %v2238_v59, %v1012_v58  ;;  %v889_v38 = vadd.f32 1e-06, %v825_v39 }
 0x14f   : > { %v890_v34 = vadd.f32 1e-06, %v826_v6  ;;  %v1364_v47 = vpop.eup %1363  ;;  %v1151_v51 = vadd.f32 %v2244_v42, %v1081_v15  ;;  %v1013_v26 = vmul.f32 %v1362_v18, %v1865_v55  ;;  %v659_v54 = vpop.xlane.xlu1 %658 }
 0x150   : > { %v662_v30 = vpop.xlane.xlu0 %661  ;;  %v1152_v23 = vadd.f32 %v2244_v42, %v1082_v7  ;;  %v1014_v10 = vmul.f32 %v1364_v47, %v1874_v2  ;;  %1373 = vrsqrt.f32 %v889_v38  ;;  %v827_v31 = vmul.f32 0.03125, %v659_v54 }
 0x151   : > { %1215 = vst.msk [vmem:[%s2252_s25 + $0x8] sm:$0xff] %vm238_vm0, %v1151_v51  ;;  %v1083_v1 = vmul.f32 %v2238_v59, %v1013_v26  ;;  %1375 = vrsqrt.f32 %v890_v34  ;;  %v828_v50 = vmul.f32 0.03125, %v662_v30 }
 0x152   : > { %v1366_v58 = vpop.eup %1365  ;;  %1216 = vst.msk [vmem:[%s2252_s25 + $0x10] sm:$0xff] %vm238_vm0, %v1152_v23  ;;  %v1084_v55 = vmul.f32 %v2238_v59, %v1014_v10  ;;  %v891_v39 = vadd.f32 1e-06, %v827_v31 }
 0x153   : > { %v1368_v6 = vpop.eup %1367  ;;  %v1153_v15 = vadd.f32 %v2244_v42, %v1083_v1  ;;  %v1015_v2 = vmul.f32 %v1366_v58, %v1877_v5  ;;  %v892_v38 = vadd.f32 1e-06, %v828_v50  ;;  %v665_v18 = vpop.xlane.xlu1 %664 }
 0x154   : > { %v668_v7 = vpop.xlane.xlu0 %667  ;;  %v1154_v47 = vadd.f32 %v2244_v42, %v1084_v55  ;;  %v1016_v34 = vmul.f32 %v1368_v6, %v1886_v62  ;;  %1377 = vrsqrt.f32 %v891_v39  ;;  %v829_v51 = vmul.f32 0.03125, %v665_v18 }
 0x155   : > { %1217 = vst.msk [vmem:[%s2252_s25 + $0x18] sm:$0xff] %vm238_vm0, %v1153_v15  ;;  %v1085_v26 = vmul.f32 %v2238_v59, %v1015_v2  ;;  %1379 = vrsqrt.f32 %v892_v38  ;;  %v830_v54 = vmul.f32 0.03125, %v668_v7 }
 0x156   : > { %v1370_v30 = vpop.eup %1369  ;;  %1218 = vst.msk [vmem:[%s2252_s25 + $0x20] sm:$0xff] %vm238_vm0, %v1154_v47  ;;  %v1086_v5 = vmul.f32 %v2238_v59, %v1016_v34  ;;  %v893_v23 = vadd.f32 1e-06, %v829_v51 }
 0x157   : > { %v1372_v10 = vpop.eup %1371  ;;  %v1155_v31 = vadd.f32 %v2244_v42, %v1085_v26  ;;  %v1017_v62 = vmul.f32 %v1370_v30, %v1889_v9  ;;  %v894_v1 = vadd.f32 1e-06, %v830_v54  ;;  %v671_v50 = vpop.xlane.xlu1 %670 }
 0x158   : > { %v674_v58 = vpop.xlane.xlu0 %673  ;;  %v1156_v55 = vadd.f32 %v2244_v42, %v1086_v5  ;;  %v1018_v39 = vmul.f32 %v1372_v10, %v1898_v0  ;;  %1381 = vrsqrt.f32 %v893_v23  ;;  %v831_v6 = vmul.f32 0.03125, %v671_v50 }
 0x159   : > { %1219 = vst.msk [vmem:[%s2252_s25 + $0x28] sm:$0xff] %vm238_vm0, %v1155_v31  ;;  %v1087_v15 = vmul.f32 %v2238_v59, %v1017_v62  ;;  %1383 = vrsqrt.f32 %v894_v1  ;;  %v832_v2 = vmul.f32 0.03125, %v674_v58 }
 0x15a   : > { %v1374_v38 = vpop.eup %1373  ;;  %1220 = vst.msk [vmem:[%s2252_s25 + $0x30] sm:$0xff] %vm238_vm0, %v1156_v55  ;;  %v1088_v9 = vmul.f32 %v2238_v59, %v1018_v39  ;;  %v895_v18 = vadd.f32 1e-06, %v831_v6 }
 0x15b   : > { %v1376_v7 = vpop.eup %1375  ;;  %v1157_v47 = vadd.f32 %v2244_v42, %v1087_v15  ;;  %v1019_v0 = vmul.f32 %v1374_v38, %v1901_v13  ;;  %v896_v34 = vadd.f32 1e-06, %v832_v2  ;;  %v677_v51 = vpop.xlane.xlu1 %676 }
 0x15c   : > { %v680_v26 = vpop.xlane.xlu0 %679  ;;  %v1158_v54 = vadd.f32 %v2244_v42, %v1088_v9  ;;  %v1020_v30 = vmul.f32 %v1376_v7, %v1910_v22  ;;  %1385 = vrsqrt.f32 %v895_v18  ;;  %v833_v5 = vmul.f32 0.03125, %v677_v51 }
 0x15d   : > { %1221 = vst.msk [vmem:[%s2252_s25 + $0x38] sm:$0xff] %vm238_vm0, %v1157_v47  ;;  %v1089_v23 = vmul.f32 %v2238_v59, %v1019_v0  ;;  %1387 = vrsqrt.f32 %v896_v34  ;;  %v834_v10 = vmul.f32 0.03125, %v680_v26 }
 0x15e   : > { %v1378_v31 = vpop.eup %1377  ;;  %1222 = vst.msk [vmem:[%s2252_s25 + $0x40] sm:$0xff] %vm238_vm0, %v1158_v54  ;;  %v1090_v13 = vmul.f32 %v2238_v59, %v1020_v30  ;;  %v897_v62 = vadd.f32 1e-06, %v833_v5 }
 0x15f   : > { %v1380_v1 = vpop.eup %1379  ;;  %v1159_v50 = vadd.f32 %v2244_v42, %v1089_v23  ;;  %v1021_v22 = vmul.f32 %v1378_v31, %v1913_v17  ;;  %v898_v58 = vadd.f32 1e-06, %v834_v10  ;;  %v683_v55 = vpop.xlane.xlu1 %682 }
 0x160   : > { %v686_v39 = vpop.xlane.xlu0 %685  ;;  %v1160_v6 = vadd.f32 %v2244_v42, %v1090_v13  ;;  %v1022_v15 = vmul.f32 %v1380_v1, %v1922_v63  ;;  %1389 = vrsqrt.f32 %v897_v62  ;;  %v835_v2 = vmul.f32 0.03125, %v683_v55 }
 0x161   : > { %1223 = vst.msk [vmem:[%s2252_s25 + $0x48] sm:$0xff] %vm238_vm0, %v1159_v50  ;;  %v1091_v38 = vmul.f32 %v2238_v59, %v1021_v22  ;;  %1391 = vrsqrt.f32 %v898_v58  ;;  %v836_v9 = vmul.f32 0.03125, %v686_v39 }
 0x162   : > { %v1382_v18 = vpop.eup %1381  ;;  %1224 = vst.msk [vmem:[%s2252_s25 + $0x50] sm:$0xff] %vm238_vm0, %v1160_v6  ;;  %v1092_v17 = vmul.f32 %v2238_v59, %v1022_v15  ;;  %v899_v7 = vadd.f32 1e-06, %v835_v2 }
 0x163   : > { %v1384_v47 = vpop.eup %1383  ;;  %v1161_v0 = vadd.f32 %v2244_v42, %v1091_v38  ;;  %v1023_v63 = vmul.f32 %v1382_v18, %v1925_v21  ;;  %v900_v34 = vadd.f32 1e-06, %v836_v9  ;;  %v689_v51 = vpop.xlane.xlu1 %688 }
 0x164   : > { %v692_v26 = vpop.xlane.xlu0 %691  ;;  %v1162_v54 = vadd.f32 %v2244_v42, %v1092_v17  ;;  %v1024_v30 = vmul.f32 %v1384_v47, %v1934_v46  ;;  %1393 = vrsqrt.f32 %v899_v7  ;;  %v837_v5 = vmul.f32 0.03125, %v689_v51 }
 0x165   : > { %1225 = vst.msk [vmem:[%s2252_s25 + $0x58] sm:$0xff] %vm238_vm0, %v1161_v0  ;;  %v1093_v23 = vmul.f32 %v2238_v59, %v1023_v63  ;;  %1395 = vrsqrt.f32 %v900_v34  ;;  %v838_v10 = vmul.f32 0.03125, %v692_v26 }
 0x166   : > { %v1386_v31 = vpop.eup %1385  ;;  %1226 = vst.msk [vmem:[%s2252_s25 + $0x60] sm:$0xff] %vm238_vm0, %v1162_v54  ;;  %v1094_v21 = vmul.f32 %v2238_v59, %v1024_v30  ;;  %v901_v13 = vadd.f32 1e-06, %v837_v5 }
 0x167   : > { %v1388_v62 = vpop.eup %1387  ;;  %v1163_v1 = vadd.f32 %v2244_v42, %v1093_v23  ;;  %v1025_v46 = vmul.f32 %v1386_v31, %v1937_v25  ;;  %v902_v50 = vadd.f32 1e-06, %v838_v10  ;;  %v695_v22 = vpop.xlane.xlu1 %694 }
 0x168   : > { %v698_v58 = vpop.xlane.xlu0 %697  ;;  %v1164_v55 = vadd.f32 %v2244_v42, %v1094_v21  ;;  %v1026_v39 = vmul.f32 %v1388_v62, %v1946_v14  ;;  %1397 = vrsqrt.f32 %v901_v13  ;;  %v839_v6 = vmul.f32 0.03125, %v695_v22 }
 0x169   : > { %1227 = vst.msk [vmem:[%s2252_s25 + $0x68] sm:$0xff] %vm238_vm0, %v1163_v1  ;;  %v1095_v15 = vmul.f32 %v2238_v59, %v1025_v46  ;;  %1399 = vrsqrt.f32 %v902_v50  ;;  %v840_v2 = vmul.f32 0.03125, %v698_v58 }
 0x16a   : > { %v1390_v38 = vpop.eup %1389  ;;  %1228 = vst.msk [vmem:[%s2252_s25 + $0x70] sm:$0xff] %vm238_vm0, %v1164_v55  ;;  %v1096_v25 = vmul.f32 %v2238_v59, %v1026_v39  ;;  %v903_v9 = vadd.f32 1e-06, %v839_v6 }
 0x16b   : > { %v1392_v18 = vpop.eup %1391  ;;  %v1165_v17 = vadd.f32 %v2244_v42, %v1095_v15  ;;  %v1027_v14 = vmul.f32 %v1390_v38, %v1949_v29  ;;  %v904_v7 = vadd.f32 1e-06, %v840_v2  ;;  %v701_v47 = vpop.xlane.xlu1 %700 }
 0x16c   : > { %v704_v0 = vpop.xlane.xlu0 %703  ;;  %v1166_v63 = vadd.f32 %v2244_v42, %v1096_v25  ;;  %v1028_v34 = vmul.f32 %v1392_v18, %v1958_v8  ;;  %1401 = vrsqrt.f32 %v903_v9  ;;  %v841_v51 = vmul.f32 0.03125, %v701_v47 }
 0x16d   : > { %1229 = vst.msk [vmem:[%s2252_s25 + $0x78] sm:$0xff] %vm238_vm0, %v1165_v17  ;;  %v1097_v26 = vmul.f32 %v2238_v59, %v1027_v14  ;;  %1403 = vrsqrt.f32 %v904_v7  ;;  %v842_v54 = vmul.f32 0.03125, %v704_v0 }
 0x16e   : > { %v1394_v30 = vpop.eup %1393  ;;  %1230 = vst.msk [vmem:[%s2252_s25 + $0x80] sm:$0xff] %vm238_vm0, %v1166_v63  ;;  %v1098_v29 = vmul.f32 %v2238_v59, %v1028_v34  ;;  %v905_v5 = vadd.f32 1e-06, %v841_v51 }
 0x16f   : > { %v1396_v23 = vpop.eup %1395  ;;  %v1167_v10 = vadd.f32 %v2244_v42, %v1097_v26  ;;  %v1029_v8 = vmul.f32 %v1394_v30, %v1961_v33  ;;  %v906_v31 = vadd.f32 1e-06, %v842_v54  ;;  %v707_v21 = vpop.xlane.xlu1 %706 }
 0x170   : > { %v710_v13 = vpop.xlane.xlu0 %709  ;;  %v1168_v62 = vadd.f32 %v2244_v42, %v1098_v29  ;;  %v1030_v1 = vmul.f32 %v1396_v23, %v1970_v12  ;;  %1405 = vrsqrt.f32 %v905_v5  ;;  %v843_v46 = vmul.f32 0.03125, %v707_v21 }
 0x171   : > { %1231 = vst.msk [vmem:[%s2252_s25 + $0x88] sm:$0xff] %vm238_vm0, %v1167_v10  ;;  %v1099_v50 = vmul.f32 %v2238_v59, %v1029_v8  ;;  %1407 = vrsqrt.f32 %v906_v31  ;;  %v844_v22 = vmul.f32 0.03125, %v710_v13 }
 0x172   : > { %v1398_v58 = vpop.eup %1397  ;;  %1232 = vst.msk [vmem:[%s2252_s25 + $0x90] sm:$0xff] %vm238_vm0, %v1168_v62  ;;  %v1100_v33 = vmul.f32 %v2238_v59, %v1030_v1  ;;  %v907_v55 = vadd.f32 1e-06, %v843_v46 }
 0x173   : > { %v1400_v39 = vpop.eup %1399  ;;  %v1169_v6 = vadd.f32 %v2244_v42, %v1099_v50  ;;  %v1031_v12 = vmul.f32 %v1398_v58, %v1973_v37  ;;  %v908_v15 = vadd.f32 1e-06, %v844_v22  ;;  %v713_v2 = vpop.xlane.xlu1 %712 }
 0x174   : > { %v716_v38 = vpop.xlane.xlu0 %715  ;;  %v1170_v25 = vadd.f32 %v2244_v42, %v1100_v33  ;;  %v1032_v9 = vmul.f32 %v1400_v39, %v1982_v16  ;;  %1409 = vrsqrt.f32 %v907_v55  ;;  %v845_v18 = vmul.f32 0.03125, %v713_v2 }
 0x175   : > { %1233 = vst.msk [vmem:[%s2252_s25 + $0x98] sm:$0xff] %vm238_vm0, %v1169_v6  ;;  %v1101_v17 = vmul.f32 %v2238_v59, %v1031_v12  ;;  %1411 = vrsqrt.f32 %v908_v15  ;;  %v846_v14 = vmul.f32 0.03125, %v716_v38 }
 0x176   : > { %v1402_v7 = vpop.eup %1401  ;;  %1234 = vst.msk [vmem:[%s2252_s25 + $0xa0] sm:$0xff] %vm238_vm0, %v1170_v25  ;;  %v1102_v37 = vmul.f32 %v2238_v59, %v1032_v9  ;;  %v909_v47 = vadd.f32 1e-06, %v845_v18 }
 0x177   : > { %v1404_v0 = vpop.eup %1403  ;;  %v1171_v63 = vadd.f32 %v2244_v42, %v1101_v17  ;;  %v1033_v16 = vmul.f32 %v1402_v7, %v1985_v41  ;;  %v910_v34 = vadd.f32 1e-06, %v846_v14  ;;  %v719_v51 = vpop.xlane.xlu1 %718 }
 0x178   : > { %v722_v26 = vpop.xlane.xlu0 %721  ;;  %v1172_v54 = vadd.f32 %v2244_v42, %v1102_v37  ;;  %v1034_v30 = vmul.f32 %v1404_v0, %v1994_v20  ;;  %1413 = vrsqrt.f32 %v909_v47  ;;  %v847_v29 = vmul.f32 0.03125, %v719_v51 }
 0x179   : > { %1235 = vst.msk [vmem:[%s2252_s25 + $0xa8] sm:$0xff] %vm238_vm0, %v1171_v63  ;;  %v1103_v5 = vmul.f32 %v2238_v59, %v1033_v16  ;;  %1415 = vrsqrt.f32 %v910_v34  ;;  %v848_v23 = vmul.f32 0.03125, %v722_v26 }
 0x17a   : > { %v1406_v10 = vpop.eup %1405  ;;  %1236 = vst.msk [vmem:[%s2252_s25 + $0xb0] sm:$0xff] %vm238_vm0, %v1172_v54  ;;  %v1104_v41 = vmul.f32 %v2238_v59, %v1034_v30  ;;  %v911_v8 = vadd.f32 1e-06, %v847_v29 }
 0x17b   : > { %v1408_v31 = vpop.eup %1407  ;;  %v1173_v21 = vadd.f32 %v2244_v42, %v1103_v5  ;;  %v1035_v20 = vmul.f32 %v1406_v10, %v1997_v45  ;;  %v912_v13 = vadd.f32 1e-06, %v848_v23  ;;  %v725_v62 = vpop.xlane.xlu1 %724 }
 0x17c   : > { %v728_v1 = vpop.xlane.xlu0 %727  ;;  %v1174_v46 = vadd.f32 %v2244_v42, %v1104_v41  ;;  %v1036_v50 = vmul.f32 %v1408_v31, %v2006_v24  ;;  %1417 = vrsqrt.f32 %v911_v8  ;;  %v849_v22 = vmul.f32 0.03125, %v725_v62 }
 0x17d   : > { %1237 = vst.msk [vmem:[%s2252_s25 + $0xb8] sm:$0xff] %vm238_vm0, %v1173_v21  ;;  %v1105_v58 = vmul.f32 %v2238_v59, %v1035_v20  ;;  %1419 = vrsqrt.f32 %v912_v13  ;;  %v850_v33 = vmul.f32 0.03125, %v728_v1 }
 0x17e   : > { %v1410_v55 = vpop.eup %1409  ;;  %1238 = vst.msk [vmem:[%s2252_s25 + $0xc0] sm:$0xff] %vm238_vm0, %v1174_v46  ;;  %v1106_v45 = vmul.f32 %v2238_v59, %v1036_v50  ;;  %v913_v39 = vadd.f32 1e-06, %v849_v22 }
 0x17f   : > { %v1412_v6 = vpop.eup %1411  ;;  %v1175_v12 = vadd.f32 %v2244_v42, %v1105_v58  ;;  %v1037_v24 = vmul.f32 %v1410_v55, %v2009_v49  ;;  %v914_v15 = vadd.f32 1e-06, %v850_v33  ;;  %v731_v2 = vpop.xlane.xlu1 %730 }
 0x180   : > { %v734_v38 = vpop.xlane.xlu0 %733  ;;  %v1176_v25 = vadd.f32 %v2244_v42, %v1106_v45  ;;  %v1038_v9 = vmul.f32 %v1412_v6, %v2018_v28  ;;  %1421 = vrsqrt.f32 %v913_v39  ;;  %v851_v18 = vmul.f32 0.03125, %v731_v2 }
 0x181   : > { %1239 = vst.msk [vmem:[%s2252_s25 + $0xc8] sm:$0xff] %vm238_vm0, %v1175_v12  ;;  %v1107_v17 = vmul.f32 %v2238_v59, %v1037_v24  ;;  %1423 = vrsqrt.f32 %v914_v15  ;;  %v852_v14 = vmul.f32 0.03125, %v734_v38 }
 0x182   : > { %v1414_v7 = vpop.eup %1413  ;;  %1240 = vst.msk [vmem:[%s2252_s25 + $0xd0] sm:$0xff] %vm238_vm0, %v1176_v25  ;;  %v1108_v49 = vmul.f32 %v2238_v59, %v1038_v9  ;;  %v915_v37 = vadd.f32 1e-06, %v851_v18 }
 0x183   : > { %v1416_v47 = vpop.eup %1415  ;;  %v1177_v0 = vadd.f32 %v2244_v42, %v1107_v17  ;;  %v1039_v28 = vmul.f32 %v1414_v7, %v2021_v53  ;;  %v916_v63 = vadd.f32 1e-06, %v852_v14  ;;  %v737_v16 = vpop.xlane.xlu1 %736 }
 0x184   : > { %v740_v34 = vpop.xlane.xlu0 %739  ;;  %v1178_v51 = vadd.f32 %v2244_v42, %v1108_v49  ;;  %v1040_v26 = vmul.f32 %v1416_v47, %v2030_v32  ;;  %1425 = vrsqrt.f32 %v915_v37  ;;  %v853_v54 = vmul.f32 0.03125, %v737_v16 }
 0x185   : > { %1241 = vst.msk [vmem:[%s2252_s25 + $0xd8] sm:$0xff] %vm238_vm0, %v1177_v0  ;;  %v1109_v30 = vmul.f32 %v2238_v59, %v1039_v28  ;;  %1427 = vrsqrt.f32 %v916_v63  ;;  %v854_v29 = vmul.f32 0.03125, %v740_v34 }
 0x186   : > { %v1418_v5 = vpop.eup %1417  ;;  %1242 = vst.msk [vmem:[%s2252_s25 + $0xe0] sm:$0xff] %vm238_vm0, %v1178_v51  ;;  %v1110_v53 = vmul.f32 %v2238_v59, %v1040_v26  ;;  %v917_v23 = vadd.f32 1e-06, %v853_v54 }
 0x187   : > { %v1420_v10 = vpop.eup %1419  ;;  %v1179_v41 = vadd.f32 %v2244_v42, %v1109_v30  ;;  %v1041_v32 = vmul.f32 %v1418_v5, %v2033_v57  ;;  %v918_v8 = vadd.f32 1e-06, %v854_v29  ;;  %v743_v31 = vpop.xlane.xlu1 %742 }
 0x188   : > { %v746_v21 = vpop.xlane.xlu0 %745  ;;  %v1180_v20 = vadd.f32 %v2244_v42, %v1110_v53  ;;  %v1042_v13 = vmul.f32 %v1420_v10, %v2042_v36  ;;  %1429 = vrsqrt.f32 %v917_v23  ;;  %v855_v62 = vmul.f32 0.03125, %v743_v31 }
 0x189   : > { %1243 = vst.msk [vmem:[%s2252_s25 + $0xe8] sm:$0xff] %vm238_vm0, %v1179_v41  ;;  %v1111_v1 = vmul.f32 %v2238_v59, %v1041_v32  ;;  %1431 = vrsqrt.f32 %v918_v8  ;;  %v856_v46 = vmul.f32 0.03125, %v746_v21 }
 0x18a   : > { %v1422_v50 = vpop.eup %1421  ;;  %1244 = vst.msk [vmem:[%s2252_s25 + $0xf0] sm:$0xff] %vm238_vm0, %v1180_v20  ;;  %v1112_v57 = vmul.f32 %v2238_v59, %v1042_v13  ;;  %v919_v22 = vadd.f32 1e-06, %v855_v62 }
 0x18b   : > { %v1424_v58 = vpop.eup %1423  ;;  %v1181_v33 = vadd.f32 %v2244_v42, %v1111_v1  ;;  %v1043_v36 = vmul.f32 %v1422_v50, %v2045_v61  ;;  %v920_v55 = vadd.f32 1e-06, %v856_v46  ;;  %v749_v45 = vpop.xlane.xlu1 %748 }
 0x18c   : > { %v752_v39 = vpop.xlane.xlu0 %751  ;;  %v1182_v6 = vadd.f32 %v2244_v42, %v1112_v57  ;;  %v1044_v12 = vmul.f32 %v1424_v58, %v2054_v40  ;;  %1433 = vrsqrt.f32 %v919_v22  ;;  %v857_v24 = vmul.f32 0.03125, %v749_v45 }
 0x18d   : > { %1245 = vst.msk [vmem:[%s2252_s25 + $0xf8] sm:$0xff] %vm238_vm0, %v1181_v33  ;;  %v1113_v15 = vmul.f32 %v2238_v59, %v1043_v36  ;;  %1435 = vrsqrt.f32 %v920_v55  ;;  %v858_v2 = vmul.f32 0.03125, %v752_v39 }
 0x18e   : > { %v1426_v38 = vpop.eup %1425  ;;  %1246 = vst.msk [vmem:[%s2252_s25 + $0x100] sm:$0xff] %vm238_vm0, %v1182_v6  ;;  %v1114_v61 = vmul.f32 %v2238_v59, %v1044_v12  ;;  %v921_v25 = vadd.f32 1e-06, %v857_v24 }
 0x18f   : > { %v1428_v9 = vpop.eup %1427  ;;  %v1183_v18 = vadd.f32 %v2244_v42, %v1113_v15  ;;  %v1045_v40 = vmul.f32 %v1426_v38, %v2057_v4  ;;  %v922_v17 = vadd.f32 1e-06, %v858_v2  ;;  %v755_v14 = vpop.xlane.xlu1 %754 }
 0x190   : > { %v758_v7 = vpop.xlane.xlu0 %757  ;;  %v1184_v49 = vadd.f32 %v2244_v42, %v1114_v61  ;;  %v1046_v37 = vmul.f32 %v1428_v9, %v2066_v44  ;;  %1437 = vrsqrt.f32 %v921_v25  ;;  %v859_v47 = vmul.f32 0.03125, %v755_v14 }
 0x191   : > { %1247 = vst.msk [vmem:[%s2252_s25 + $0x108] sm:$0xff] %vm238_vm0, %v1183_v18  ;;  %v1115_v0 = vmul.f32 %v2238_v59, %v1045_v40  ;;  %1439 = vrsqrt.f32 %v922_v17  ;;  %v860_v28 = vmul.f32 0.03125, %v758_v7 }
 0x192   : > { %v1430_v63 = vpop.eup %1429  ;;  %1248 = vst.msk [vmem:[%s2252_s25 + $0x110] sm:$0xff] %vm238_vm0, %v1184_v49  ;;  %v1116_v4 = vmul.f32 %v2238_v59, %v1046_v37  ;;  %v923_v16 = vadd.f32 1e-06, %v859_v47 }
 0x193   : > { %v1432_v34 = vpop.eup %1431  ;;  %v1185_v51 = vadd.f32 %v2244_v42, %v1115_v0  ;;  %v1047_v44 = vmul.f32 %v1430_v63, %v2069_v11  ;;  %v924_v26 = vadd.f32 1e-06, %v860_v28  ;;  %v761_v54 = vpop.xlane.xlu1 %760 }
 0x194   : > { %v764_v30 = vpop.xlane.xlu0 %763  ;;  %v1186_v29 = vadd.f32 %v2244_v42, %v1116_v4  ;;  %v1048_v5 = vmul.f32 %v1432_v34, %v2078_v48  ;;  %1441 = vrsqrt.f32 %v923_v16  ;;  %v861_v53 = vmul.f32 0.03125, %v761_v54 }
 0x195   : > { %1249 = vst.msk [vmem:[%s2252_s25 + $0x118] sm:$0xff] %vm238_vm0, %v1185_v51  ;;  %v1117_v23 = vmul.f32 %v2238_v59, %v1047_v44  ;;  %1443 = vrsqrt.f32 %v924_v26  ;;  %v862_v10 = vmul.f32 0.03125, %v764_v30 }
 0x196   : > { %v1434_v41 = vpop.eup %1433  ;;  %1250 = vst.msk [vmem:[%s2252_s25 + $0x120] sm:$0xff] %vm238_vm0, %v1186_v29  ;;  %v1118_v11 = vmul.f32 %v2238_v59, %v1048_v5  ;;  %v925_v32 = vadd.f32 1e-06, %v861_v53 }
 0x197   : > { %v1436_v8 = vpop.eup %1435  ;;  %v1187_v31 = vadd.f32 %v2244_v42, %v1117_v23  ;;  %v1049_v48 = vmul.f32 %v1434_v41, %v2081_v19  ;;  %v926_v21 = vadd.f32 1e-06, %v862_v10  ;;  %v767_v20 = vpop.xlane.xlu1 %766 }
 0x198   : > { %v770_v13 = vpop.xlane.xlu0 %769  ;;  %v1188_v62 = vadd.f32 %v2244_v42, %v1118_v11  ;;  %v1050_v1 = vmul.f32 %v1436_v8, %v2090_v52  ;;  %1445 = vrsqrt.f32 %v925_v32  ;;  %v863_v46 = vmul.f32 0.03125, %v767_v20 }
 0x199   : > { %1251 = vst.msk [vmem:[%s2252_s25 + $0x128] sm:$0xff] %vm238_vm0, %v1187_v31  ;;  %v1119_v50 = vmul.f32 %v2238_v59, %v1049_v48  ;;  %1447 = vrsqrt.f32 %v926_v21  ;;  %v864_v57 = vmul.f32 0.03125, %v770_v13  ;;  %v2646_v48 = vld [vmem:[#allocation17_spill] sm:$0xff] }
 0x19a   : > { %v1438_v22 = vpop.eup %1437  ;;  %1252 = vst.msk [vmem:[%s2252_s25 + $0x130] sm:$0xff] %vm238_vm0, %v1188_v62  ;;  %v1120_v19 = vmul.f32 %v2238_v59, %v1050_v1  ;;  %v927_v58 = vadd.f32 1e-06, %v863_v46 }
 0x19b   : > { %v1440_v33 = vpop.eup %1439  ;;  %v1189_v36 = vadd.f32 %v2244_v42, %v1119_v50  ;;  %v1051_v52 = vmul.f32 %v1438_v22, %v2093_v27  ;;  %v928_v55 = vadd.f32 1e-06, %v864_v57  ;;  %v773_v45 = vpop.xlane.xlu1 %772 }
 0x19c   : > { %v776_v39 = vpop.xlane.xlu0 %775  ;;  %v1190_v6 = vadd.f32 %v2244_v42, %v1120_v19  ;;  %v1052_v12 = vmul.f32 %v1440_v33, %v2102_v56  ;;  %1449 = vrsqrt.f32 %v927_v58  ;;  %v865_v24 = vmul.f32 0.03125, %v773_v45  ;;  %v2647_v19 = vld [vmem:[#allocation18_spill] sm:$0xff] }
 0x19d   : > { %1253 = vst.msk [vmem:[%s2252_s25 + $0x138] sm:$0xff] %vm238_vm0, %v1189_v36  ;;  %v1121_v15 = vmul.f32 %v2238_v59, %v1051_v52  ;;  %1451 = vrsqrt.f32 %v928_v55  ;;  %v866_v2 = vmul.f32 0.03125, %v776_v39  ;;  %v2648_v45 = vld [vmem:[#allocation2_spill] sm:$0xff] }
 0x19e   : > { %v1442_v38 = vpop.eup %1441  ;;  %1254 = vst.msk [vmem:[%s2252_s25 + $0x140] sm:$0xff] %vm238_vm0, %v1190_v6  ;;  %v1122_v27 = vmul.f32 %v2238_v59, %v1052_v12  ;;  %v929_v61 = vadd.f32 1e-06, %v865_v24 }
 0x19f   : > { %v1444_v25 = vpop.eup %1443  ;;  %v1191_v9 = vadd.f32 %v2244_v42, %v1121_v15  ;;  %v1053_v56 = vmul.f32 %v1442_v38, %v2105_v35  ;;  %v930_v18 = vadd.f32 1e-06, %v866_v2  ;;  %v779_v40 = vpop.xlane.xlu1 %778 }
 0x1a0   : > { %v782_v17 = vpop.xlane.xlu0 %781  ;;  %v1192_v14 = vadd.f32 %v2244_v42, %v1122_v27  ;;  %v1054_v7 = vmul.f32 %v1444_v25, %v2114_v60  ;;  %1453 = vrsqrt.f32 %v929_v61  ;;  %v867_v49 = vmul.f32 0.03125, %v779_v40  ;;  %v2649_v25 = vld [vmem:[#allocation3_spill] sm:$0xff] }
 0x1a1   : > { %1255 = vst.msk [vmem:[%s2252_s25 + $0x148] sm:$0xff] %vm238_vm0, %v1191_v9  ;;  %v1123_v37 = vmul.f32 %v2238_v59, %v1053_v56  ;;  %1455 = vrsqrt.f32 %v930_v18  ;;  %v868_v47 = vmul.f32 0.03125, %v782_v17 }
 0x1a2   : > { %v1446_v0 = vpop.eup %1445  ;;  %1256 = vst.msk [vmem:[%s2252_s25 + $0x150] sm:$0xff] %vm238_vm0, %v1192_v14  ;;  %v1124_v35 = vmul.f32 %v2238_v59, %v1054_v7  ;;  %v931_v28 = vadd.f32 1e-06, %v867_v49  ;;  %v2650_v14 = vld [vmem:[#allocation4_spill] sm:$0xff] }
 0x1a3   : > { %v1448_v63 = vpop.eup %1447  ;;  %v1193_v4 = vadd.f32 %v2244_v42, %v1123_v37  ;;  %v1055_v60 = vmul.f32 %v1446_v0, %v2117_v43  ;;  %v932_v16 = vadd.f32 1e-06, %v868_v47  ;;  %v785_v34 = vpop.xlane.xlu1 %784 }
 0x1a4   : > { %v788_v51 = vpop.xlane.xlu0 %787  ;;  %v1194_v44 = vadd.f32 %v2244_v42, %v1124_v35  ;;  %v1056_v26 = vmul.f32 %v1448_v63, %v2126_v3  ;;  %1457 = vrsqrt.f32 %v931_v28  ;;  %v869_v54 = vmul.f32 0.03125, %v785_v34  ;;  %v2645_v3 = vld [vmem:[#allocation16_spill] sm:$0xff] }
 0x1a5   : > { %1257 = vst.msk [vmem:[%s2252_s25 + $0x158] sm:$0xff] %vm238_vm0, %v1193_v4  ;;  %v1125_v30 = vmul.f32 %v2238_v59, %v1055_v60  ;;  %1459 = vrsqrt.f32 %v932_v16  ;;  %v870_v29 = vmul.f32 0.03125, %v788_v51  ;;  %v2651_v60 = vld [vmem:[#allocation5_spill] sm:$0xff] }
 0x1a6   : > { %v1450_v5 = vpop.eup %1449  ;;  %1258 = vst.msk [vmem:[%s2252_s25 + $0x160] sm:$0xff] %vm238_vm0, %v1194_v44  ;;  %v1126_v43 = vmul.f32 %v2238_v59, %v1056_v26  ;;  %v933_v53 = vadd.f32 1e-06, %v869_v54  ;;  %v2652_v54 = vld [vmem:[#allocation6_spill] sm:$0xff] }
 0x1a7   : > { %v1452_v23 = vpop.eup %1451  ;;  %v1195_v10 = vadd.f32 %v2244_v42, %v1125_v30  ;;  %v1057_v41 = vmul.f32 %v1450_v5, %v2645_v3  ;;  %v934_v11 = vadd.f32 1e-06, %v870_v29  ;;  %v791_v32 = vpop.xlane.xlu1 %790 }
 0x1a8   : > { %v794_v8 = vpop.xlane.xlu0 %793  ;;  %v1196_v31 = vadd.f32 %v2244_v42, %v1126_v43  ;;  %v1058_v21 = vmul.f32 %v1452_v23, %v2646_v48  ;;  %1461 = vrsqrt.f32 %v933_v53  ;;  %v871_v20 = vmul.f32 0.03125, %v791_v32 }
 0x1a9   : > { %1259 = vst.msk [vmem:[%s2252_s25 + $0x168] sm:$0xff] %vm238_vm0, %v1195_v10  ;;  %v1127_v13 = vmul.f32 %v2238_v59, %v1057_v41  ;;  %1463 = vrsqrt.f32 %v934_v11  ;;  %v872_v62 = vmul.f32 0.03125, %v794_v8  ;;  %v2653_v11 = vld [vmem:[#allocation7_spill] sm:$0xff] }
 0x1aa   : > { %v1454_v1 = vpop.eup %1453  ;;  %1260 = vst.msk [vmem:[%s2252_s25 + $0x170] sm:$0xff] %vm238_vm0, %v1196_v31  ;;  %v1128_v46 = vmul.f32 %v2238_v59, %v1058_v21  ;;  %v935_v50 = vadd.f32 1e-06, %v871_v20  ;;  %v2654_v21 = vld [vmem:[#allocation8_spill] sm:$0xff] }
 0x1ab   : > { %v1456_v57 = vpop.eup %1455  ;;  %v1197_v22 = vadd.f32 %v2244_v42, %v1127_v13  ;;  %v1059_v58 = vmul.f32 %v1454_v1, %v2647_v19  ;;  %v936_v33 = vadd.f32 1e-06, %v872_v62  ;;  %v797_v36 = vpop.xlane.xlu1 %796 }
 0x1ac   : > { %v800_v52 = vpop.xlane.xlu0 %799  ;;  %v1198_v55 = vadd.f32 %v2244_v42, %v1128_v46  ;;  %v1060_v39 = vmul.f32 %v1456_v57, %v2648_v45  ;;  %1465 = vrsqrt.f32 %v935_v50  ;;  %v873_v6 = vmul.f32 0.03125, %v797_v36  ;;  %v1483_v46 = vld [vmem:[%s2566_s1] ss:$0 sm:$0xff] }
 0x1ad   : > { %1261 = vst.msk [vmem:[%s2252_s25 + $0x178] sm:$0xff] %vm238_vm0, %v1197_v22  ;;  %v1129_v12 = vmul.f32 %v2238_v59, %v1059_v58  ;;  %1467 = vrsqrt.f32 %v936_v33  ;;  %v874_v24 = vmul.f32 0.03125, %v800_v52  ;;  %v2655_v58 = vld [vmem:[#allocation9_spill] sm:$0xff]  ;;  %v2656_v52 = vld [vmem:[#allocation10_spill] sm:$0xff] }
 0x1ae   : > { %v1458_v15 = vpop.eup %1457  ;;  %1262 = vst.msk [vmem:[%s2252_s25 + $0x180] sm:$0xff] %vm238_vm0, %v1198_v55  ;;  %v1130_v2 = vmul.f32 %v2238_v59, %v1060_v39  ;;  %v937_v38 = vadd.f32 1e-06, %v873_v6 }
 0x1af   : > { %v1460_v27 = vpop.eup %1459  ;;  %v1199_v61 = vadd.f32 %v2244_v42, %v1129_v12  ;;  %v1061_v9 = vmul.f32 %v1458_v15, %v2649_v25  ;;  %v938_v56 = vadd.f32 1e-06, %v874_v24  ;;  %v803_v18 = vpop.xlane.xlu1 %802  ;;  %v2657_v24 = vld [vmem:[#allocation11_spill] sm:$0xff] }
 0x1b0   : > { %v806_v40 = vpop.xlane.xlu0 %805  ;;  %v1200_v17 = vadd.f32 %v2244_v42, %v1130_v2  ;;  %v1062_v7 = vmul.f32 %v1460_v27, %v2650_v14  ;;  %1469 = vrsqrt.f32 %v937_v38  ;;  %v875_v49 = vmul.f32 0.03125, %v803_v18  ;;  %v2658_v38 = vld [vmem:[#allocation12_spill] sm:$0xff] }
 0x1b1   : > { %1263 = vst.msk [vmem:[%s2252_s25 + $0x188] sm:$0xff] %vm238_vm0, %v1199_v61  ;;  %v1131_v37 = vmul.f32 %v2238_v59, %v1061_v9  ;;  %1471 = vrsqrt.f32 %v938_v56  ;;  %v876_v47 = vmul.f32 0.03125, %v806_v40  ;;  %v2659_v40 = vld [vmem:[#allocation13_spill] sm:$0xff] }
 0x1b2   : > { %v1462_v0 = vpop.eup %1461  ;;  %1264 = vst.msk [vmem:[%s2252_s25 + $0x190] sm:$0xff] %vm238_vm0, %v1200_v17  ;;  %v1132_v35 = vmul.f32 %v2238_v59, %v1062_v7  ;;  %v939_v28 = vadd.f32 1e-06, %v875_v49  ;;  %v2660_v7 = vld [vmem:[#allocation14_spill] sm:$0xff] }
 0x1b3   : > { %v1464_v63 = vpop.eup %1463  ;;  %v1201_v4 = vadd.f32 %v2244_v42, %v1131_v37  ;;  %v1063_v16 = vmul.f32 %v1462_v0, %v2651_v60  ;;  %v940_v34 = vadd.f32 1e-06, %v876_v47  ;;  %v809_v51 = vpop.xlane.xlu1 %808 }
 0x1b4   : > { %v812_v44 = vpop.xlane.xlu0 %811  ;;  %v1202_v26 = vadd.f32 %v2244_v42, %v1132_v35  ;;  %v1064_v30 = vmul.f32 %v1464_v63, %v2652_v54  ;;  %1473 = vrsqrt.f32 %v939_v28  ;;  %v877_v29 = vmul.f32 0.03125, %v809_v51  ;;  %v2661_v28 = vld [vmem:[#allocation19_spill] sm:$0xff] }
 0x1b5   : > { %1265 = vst.msk [vmem:[%s2252_s25 + $0x198] sm:$0xff] %vm238_vm0, %v1201_v4  ;;  %v1133_v5 = vmul.f32 %v2238_v59, %v1063_v16  ;;  %1475 = vrsqrt.f32 %v940_v34  ;;  %v878_v43 = vmul.f32 0.03125, %v812_v44 }
 0x1b6   : > { %v1466_v53 = vpop.eup %1465  ;;  %1266 = vst.msk [vmem:[%s2252_s25 + $0x1a0] sm:$0xff] %vm238_vm0, %v1202_v26  ;;  %v1134_v23 = vmul.f32 %v2238_v59, %v1064_v30  ;;  %v941_v10 = vadd.f32 1e-06, %v877_v29 }
 0x1b7   : > { %v1468_v3 = vpop.eup %1467  ;;  %v1203_v41 = vadd.f32 %v2244_v42, %v1133_v5  ;;  %v1065_v32 = vmul.f32 %v1466_v53, %v2653_v11  ;;  %v942_v8 = vadd.f32 1e-06, %v878_v43  ;;  %v815_v31 = vpop.xlane.xlu1 %814 }
 0x1b8   : > { %v1204_v48 = vadd.f32 %v2244_v42, %v1134_v23  ;;  %v1066_v20 = vmul.f32 %v1468_v3, %v2654_v21  ;;  %1477 = vrsqrt.f32 %v941_v10  ;;  %v879_v13 = vmul.f32 0.03125, %v815_v31 }
 0x1b9   : > { %1267 = vst.msk [vmem:[%s2252_s25 + $0x1a8] sm:$0xff] %vm238_vm0, %v1203_v41  ;;  %v1135_v62 = vmul.f32 %v2238_v59, %v1065_v32  ;;  %1479 = vrsqrt.f32 %v942_v8  ;;  %v1484_v59 = vld [vmem:[%s2567_s2] ss:$0 sm:$0xff] }
 0x1ba   : > { %v1470_v1 = vpop.eup %1469  ;;  %1268 = vst.msk [vmem:[%s2252_s25 + $0x1b0] sm:$0xff] %vm238_vm0, %v1204_v48  ;;  %v1136_v50 = vmul.f32 %v1483_v46, %v1066_v20  ;;  %v943_v57 = vadd.f32 1e-06, %v879_v13 }
 0x1bb   : > { %v1472_v22 = vpop.eup %1471  ;;  %v1205_v19 = vadd.f32 %v2244_v42, %v1135_v62  ;;  %v1067_v33 = vmul.f32 %v1470_v1, %v2655_v58 }
 0x1bc   : > { %v1206_v36 = vadd.f32 %v1484_v59, %v1136_v50  ;;  %v1068_v55 = vmul.f32 %v1472_v22, %v2656_v52  ;;  %1481 = vrsqrt.f32 %v943_v57 }
 0x1bd   : > { %1269 = vst.msk [vmem:[%s2252_s25 + $0x1b8] sm:$0xff] %vm238_vm0, %v1205_v19  ;;  %v1137_v45 = vmul.f32 %v1483_v46, %v1067_v33 }
 0x1be   : > { %v1474_v39 = vpop.eup %1473  ;;  %1270 = vst.msk [vmem:[%s2252_s25 + $0x1c0] sm:$0xff] %vm238_vm0, %v1206_v36  ;;  %v1138_v6 = vmul.f32 %v1483_v46, %v1068_v55 }
 0x1bf   : > { %v1476_v42 = vpop.eup %1475  ;;  %v1207_v12 = vadd.f32 %v1484_v59, %v1137_v45  ;;  %v1069_v15 = vmul.f32 %v1474_v39, %v2657_v24 }
 0x1c0   : > { %v1208_v2 = vadd.f32 %v1484_v59, %v1138_v6  ;;  %v1070_v27 = vmul.f32 %v1476_v42, %v2658_v38 }
 0x1c1   : > { %1271 = vst.msk [vmem:[%s2252_s25 + $0x1c8] sm:$0xff] %vm238_vm0, %v1207_v12  ;;  %v1139_v61 = vmul.f32 %v1483_v46, %v1069_v15 }
 0x1c2   : > { %v1478_v25 = vpop.eup %1477  ;;  %1272 = vst.msk [vmem:[%s2252_s25 + $0x1d0] sm:$0xff] %vm238_vm0, %v1208_v2  ;;  %v1140_v9 = vmul.f32 %v1483_v46, %v1070_v27 }
 0x1c3   : > { %v1480_v56 = vpop.eup %1479  ;;  %v1209_v18 = vadd.f32 %v1484_v59, %v1139_v61  ;;  %v1071_v17 = vmul.f32 %v1478_v25, %v2659_v40 }
 0x1c4   : > { %v1210_v14 = vadd.f32 %v1484_v59, %v1140_v9  ;;  %v1072_v49 = vmul.f32 %v1480_v56, %v2660_v7 }
 0x1c5   : > { %1273 = vst.msk [vmem:[%s2252_s25 + $0x1d8] sm:$0xff] %vm238_vm0, %v1209_v18  ;;  %v1141_v37 = vmul.f32 %v1483_v46, %v1071_v17 }
 0x1c6   : > { %v1482_v47 = vpop.eup %1481  ;;  %1274 = vst.msk [vmem:[%s2252_s25 + $0x1e0] sm:$0xff] %vm238_vm0, %v1210_v14  ;;  %v1142_v0 = vmul.f32 %v1483_v46, %v1072_v49 }
 0x1c7   : > { %v1211_v35 = vadd.f32 %v1484_v59, %v1141_v37  ;;  %v1073_v63 = vmul.f32 %v1482_v47, %v2661_v28 }
 0x1c8   : > { %v1212_v4 = vadd.f32 %v1484_v59, %v1142_v0 }
 0x1c9   : > { %1275 = vst.msk [vmem:[%s2252_s25 + $0x1e8] sm:$0xff] %vm238_vm0, %v1211_v35  ;;  %v1143_v60 = vmul.f32 %v1483_v46, %v1073_v63 }
 0x1ca   : > { %1276 = vst.msk [vmem:[%s2252_s25 + $0x1f0] sm:$0xff] %vm238_vm0, %v1212_v4 }
 0x1cb   : > { %v1213_v16 = vadd.f32 %v1484_v59, %v1143_v60 }
 0x1cd   : > { %1277 = vst.msk [vmem:[%s2252_s25 + $0x1f8] sm:$0xff] %vm238_vm0, %v1213_v16 }
 0x1ce PF: > { %s13_s12 = sadd.s32 1, %s1491_s12  }
 0x1cf   : > { %p10_p4 = scmp.ge.s32.totalorder %s13_s12, 4  }
 0x1d1   :  { %12 = sbr.rel (!%p10_p4) target bundleno = 1 (0x1), region = 62 }

</bundles_post_ra>
